<compile_context>
chip_gen: v5e
topology: v5e:2x2
jax: 0.10.0
libtpu: 0.0.40
codegen_flags: <defaults>
</compile_context>

<pallas_src>
import jax
import jax.numpy as jnp
from jax.experimental import pallas as pl
from jax.experimental.pallas import tpu as pltpu


def _pick_tile_h(H, W, Cin, Cpad, N, budget_bytes=20 * 1024 * 1024):
    """Largest row-tile dividing H whose per-step VMEM footprint fits the budget."""
    def vmem_est(th):
        f32 = 4
        inputs = 2 * (th + 2) * W * Cin * f32                # double-buffered row tile + halos
        weights = 9 * Cin * Cpad * 2                         # bf16, Buffered(1)
        temps = (3 * (th + 2) * W * Cin                      # xv / left / right slabs (f32)
                 + th * W * 9 * Cin                          # f32 im2col patch
                 + th * W * Cpad) * f32                      # f32 accumulator
        temps += th * W * 9 * Cin * 2                        # bf16 patch copy
        outputs = 2 * th * W * Cpad * f32                    # pass-2 output tile (upper bound)
        return inputs + weights + temps + outputs

    divisors = [d for d in range(1, H + 1) if H % d == 0]
    fits = [d for d in divisors if vmem_est(d) <= budget_bytes]
    if not fits:
        return 1
    th = max(fits)
    # Keep >= 2 parallel grid steps so both v7x TensorCores get work when N == 1.
    if N == 1 and th == H:
        smaller = [d for d in fits if d < H]
        if smaller:
            th = max(smaller)
    return th


def _conv_tile_f32(top_ref, mid_ref, bot_ref, w_ref):
    """3x3 'same' conv of one row tile: returns (TH*W, Cpad) f32 accumulator."""
    TH, W, Cin = mid_ref.shape
    i = pl.program_id(1)
    num_h = pl.num_programs(1)
    f32 = jnp.float32

    m = mid_ref[...].astype(f32)
    # Halo rows come from neighbouring tiles; the BlockSpec index was clamped at
    # the image border, so zero them here (implicit zero padding).
    t = top_ref[...].astype(f32) * jnp.where(i == 0, 0.0, 1.0)
    b = bot_ref[...].astype(f32) * jnp.where(i == num_h - 1, 0.0, 1.0)

    # Vertical slab covering input rows [i*TH - 1, i*TH + TH + 1).
    xv = jnp.concatenate([t[None], m, b[None]], axis=0)        # (TH+2, W, Cin)

    # Horizontal (kx) shifts, built once per tile.
    # TODO(synk): pltpu.roll + an edge-column mask would move these shifts to the XLU slot.
    zcol = jnp.zeros((TH + 2, 1, Cin), f32)
    left = jnp.concatenate([zcol, xv[:, :W - 1, :]], axis=1)   # tap kx=0 (col x-1)
    right = jnp.concatenate([xv[:, 1:, :], zcol], axis=1)      # tap kx=2 (col x+1)

    # Full im2col over (ky, kx): one (TH*W, 9*Cin) patch -> one MXU matmul.
    taps = []
    for ky in range(3):
        for sh in (left, xv, right):                           # kx = 0, 1, 2
            taps.append(sh[ky:ky + TH])
    patch = jnp.concatenate(taps, axis=-1).reshape(TH * W, 9 * Cin)

    return jnp.dot(patch.astype(w_ref.dtype), w_ref[...],
                   preferred_element_type=f32)                 # (TH*W, Cpad) f32


def _conv3x3_stats_kernel(top_ref, mid_ref, bot_ref, w_ref, stats_ref):
    # stats_ref: (2, Cpad) — row0 = per-tile sum, row1 = per-tile centered sum of squares
    acc = _conv_tile_f32(top_ref, mid_ref, bot_ref, w_ref)
    n_t = acc.shape[0]
    s = jnp.sum(acc, axis=0, keepdims=True)                              # (1, Cpad)
    q = jnp.sum(jnp.square(acc - s / n_t), axis=0, keepdims=True)        # (1, Cpad)
    stats_ref[0:1, :] = s
    stats_ref[1:2, :] = q


def _conv3x3_bn_relu_kernel(top_ref, mid_ref, bot_ref, w_ref,
                            scale_ref, shift_ref, o_ref):
    # Recompute the conv tile, apply fused BN scale/shift + ReLU, slice to real Cout.
    acc = _conv_tile_f32(top_ref, mid_ref, bot_ref, w_ref)               # (TH*W, Cpad)
    TH, W, Cout = o_ref.shape
    y = jnp.maximum(acc * scale_ref[...] + shift_ref[...], 0.0)
    o_ref[...] = y[:, :Cout].reshape(TH, W, Cout).astype(o_ref.dtype)


def decoder_block_forward(x_nchw, wt, bias, gamma, beta, eps=1e-5):
    """x_nchw: (N, Cin, H, W); wt: ConvTranspose2d weight (Cin, Cout, 3, 3)."""
    N, Cin, H, W = x_nchw.shape
    Cout = wt.shape[1]
    Cpad = ((Cout + 127) // 128) * 128            # lane-dense contraction output
    TH = _pick_tile_h(H, W, Cin, Cpad, N)
    num_h = H // TH

    # ConvTranspose2d(stride=1, padding=1, K=3) == Conv2d with spatially flipped
    # kernel and in/out channels swapped; flatten taps as (ky, kx, ci) rows.
    w_hwio = jnp.flip(wt, axis=(2, 3)).transpose(2, 3, 0, 1)             # (3,3,Cin,Cout)
    w_flat = w_hwio.reshape(9 * Cin, Cout)
    w_pad = jnp.pad(w_flat, ((0, 0), (0, Cpad - Cout))).astype(jnp.bfloat16)

    # Conv bias is a mathematical no-op before training-mode BatchNorm
    # (cancelled by the mean subtraction) -> drop it and its DMA entirely.
    del bias

    x_nhwc = jnp.transpose(x_nchw, (0, 2, 3, 1))                         # (N,H,W,Cin)

    top_spec = pl.BlockSpec((pl.Squeezed(), pl.Squeezed(), W, Cin),
                            lambda n, i: (n, jnp.maximum(i * TH - 1, 0), 0, 0))
    mid_spec = pl.BlockSpec((pl.Squeezed(), TH, W, Cin),
                            lambda n, i: (n, i, 0, 0))
    bot_spec = pl.BlockSpec((pl.Squeezed(), pl.Squeezed(), W, Cin),
                            lambda n, i: (n, jnp.minimum(i * TH + TH, H - 1), 0, 0))
    # Constant block, stays resident; single-buffered to save VMEM (v7x / v5e).
    w_spec = pl.BlockSpec((9 * Cin, Cpad), lambda n, i: (0, 0),
                          pipeline_mode=pl.Buffered(1))
    cparams = pltpu.CompilerParams(
        dimension_semantics=("parallel", "parallel"),
        vmem_limit_bytes=64 * 1024 * 1024)

    # Pass 1: conv tile -> per-tile BatchNorm partials only (no padded conv
    # intermediate ever touches HBM).
    stats = pl.pallas_call(
        _conv3x3_stats_kernel,
        out_shape=jax.ShapeDtypeStruct((N, num_h, 2, Cpad), jnp.float32),
        grid_spec=pltpu.PrefetchScalarGridSpec(
            num_scalar_prefetch=0,
            grid=(N, num_h),
            in_specs=[top_spec, mid_spec, bot_spec, w_spec],
            out_specs=pl.BlockSpec((pl.Squeezed(), pl.Squeezed(), 2, Cpad),
                                   lambda n, i: (n, i, 0, 0)),
        ),
        compiler_params=cparams,
    )(x_nhwc, x_nhwc, x_nhwc, w_pad)

    # Parallel-variance combine of per-tile centered partials (robust against
    # the naive E[x^2] - E[x]^2 cancellation); biased var = training-mode BN.
    n_tile = float(TH * W)
    cnt = float(N * H * W)
    tile_sum = stats[:, :, 0, :]                                         # (N, num_h, Cpad)
    tile_q = stats[:, :, 1, :]
    mean = jnp.sum(tile_sum, axis=(0, 1)) / cnt
    tile_mean = tile_sum / n_tile
    var = (jnp.sum(tile_q, axis=(0, 1))
           + n_tile * jnp.sum(jnp.square(tile_mean - mean), axis=(0, 1))) / cnt
    var = jnp.maximum(var, 0.0)
    inv = jax.lax.rsqrt(var + eps)

    gamma_p = jnp.pad(gamma.astype(jnp.float32), (0, Cpad - Cout))
    beta_p = jnp.pad(beta.astype(jnp.float32), (0, Cpad - Cout))
    scale = (gamma_p * inv).reshape(1, Cpad)
    shift = (beta_p - mean * gamma_p * inv).reshape(1, Cpad)

    const_spec = pl.BlockSpec((1, Cpad), lambda n, i: (0, 0),
                              pipeline_mode=pl.Buffered(1))

    # Pass 2: recompute the conv tile, fuse BN scale/shift + ReLU and the
    # Cpad->Cout slice; the HBM output only carries real channels.
    out_nhwc = pl.pallas_call(
        _conv3x3_bn_relu_kernel,
        out_shape=jax.ShapeDtypeStruct((N, H, W, Cout), jnp.float32),
        grid_spec=pltpu.PrefetchScalarGridSpec(
            num_scalar_prefetch=0,
            grid=(N, num_h),
            in_specs=[top_spec, mid_spec, bot_spec, w_spec, const_spec, const_spec],
            out_specs=pl.BlockSpec((pl.Squeezed(), TH, W, Cout),
                                   lambda n, i: (n, i, 0, 0)),
        ),
        compiler_params=cparams,
    )(x_nhwc, x_nhwc, x_nhwc, w_pad, scale, shift)

    # TODO(synk): for deep blocks (Cin ~ Cout ~ 512) a materialized bf16 conv
    # intermediate + separate BN pass avoids the duplicated MXU work, and a
    # W / Cout grid axis should be added when W*Cpad is large.
    return jnp.transpose(out_nhwc, (0, 3, 1, 2))                         # back to NCHW


def _reference(x_nchw, wt, bias, gamma, beta, eps=1e-5):
    # Pure-JAX reference: ConvTranspose(3,1,1) (with bias) -> BN(train) -> ReLU.
    w_hwio = jnp.flip(wt, axis=(2, 3)).transpose(2, 3, 0, 1)
    x_nhwc = jnp.transpose(x_nchw, (0, 2, 3, 1))
    conv = jax.lax.conv_general_dilated(
        x_nhwc, w_hwio, window_strides=(1, 1),
        padding=((1, 1), (1, 1)),
        dimension_numbers=("NHWC", "HWIO", "NHWC"),
    ) + bias
    mean = conv.mean(axis=(0, 1, 2), keepdims=True)
    var = conv.var(axis=(0, 1, 2), keepdims=True)
    out = (conv - mean) * jax.lax.rsqrt(var + eps) * gamma + beta
    out = jnp.maximum(out, 0.0)
    return jnp.transpose(out, (0, 3, 1, 2))


if __name__ == "__main__":
    # _DecoderBlock(in_channels=4, out_channels=8, kernel_size=3), default path.
    N, Cin, Cout, H, W = 2, 4, 8, 16, 16

    key = jax.random.PRNGKey(0)
    kx, kw, kb = jax.random.split(key, 3)
    x = jax.random.normal(kx, (N, Cin, H, W), jnp.float32)
    # ConvTranspose2d weight shape: (in_channels, out_channels, kH, kW)
    wt = 0.1 * jax.random.normal(kw, (Cin, Cout, 3, 3), jnp.float32)
    bias = 0.1 * jax.random.normal(kb, (Cout,), jnp.float32)
    gamma = jnp.ones((Cout,), jnp.float32)    # BatchNorm2d init: weight = 1
    beta = jnp.zeros((Cout,), jnp.float32)    # BatchNorm2d init: bias = 0

    out = decoder_block_forward(x, wt, bias, gamma, beta)
    out = jax.block_until_ready(out)

    ref = _reference(x, wt, bias, gamma, beta)
    assert out.shape == (N, Cout, H, W)
    # bf16 MXU operands (f32 accumulation) -> looser tolerance than all-f32.
    err = float(jnp.max(jnp.abs(out - ref)))
    assert err < 5e-2, f"mismatch vs reference: {err}"

    print("KERNEL_OK")
</pallas_src>

<mosaic_0001>
module attributes {stable_mosaic.version = 11 : i64} {
  func.func @_conv3x3_stats_kernel(%arg0: i32, %arg1: i32, %arg2: memref<1x1x16x4xf32, #tpu.memory_space<vmem>>, %arg3: memref<1x16x16x4xf32, #tpu.memory_space<vmem>>, %arg4: memref<1x1x16x4xf32, #tpu.memory_space<vmem>>, %arg5: memref<36x128xbf16, #tpu.memory_space<vmem>>, %arg6: memref<1x1x2x128xf32, #tpu.memory_space<vmem>>) attributes {dimension_semantics = [#tpu.dimension_semantics<parallel>, #tpu.dimension_semantics<parallel>], iteration_bounds = array<i64: 2, 1>, scalar_prefetch = 0 : i64, scratch_operands = 0 : i64, tpu.core_type = #tpu.core_type<tc>, window_params = [{transform_indices = @transform_0, window_bounds = array<i64: 1, 1, 16, 4>}, {transform_indices = @transform_1, window_bounds = array<i64: 1, 16, 16, 4>}, {transform_indices = @transform_2, window_bounds = array<i64: 1, 1, 16, 4>}, {pipeline_mode = #tpu.pipeline_mode<synchronous>, transform_indices = @transform_3, window_bounds = array<i64: 36, 128>}, {transform_indices = @transform_4, window_bounds = array<i64: 1, 1, 2, 128>}]} {
    %c0 = arith.constant 0 : index
    %c0_0 = arith.constant 0 : index
    %c0_1 = arith.constant 0 : index
    %c0_2 = arith.constant 0 : index
    %0 = vector.load %arg3[%c0, %c0_0, %c0_1, %c0_2] : memref<1x16x16x4xf32, #tpu.memory_space<vmem>>, vector<1x16x16x4xf32>
    %1 = vector.shape_cast %0 : vector<1x16x16x4xf32> to vector<16x16x4xf32>
    %c0_3 = arith.constant 0 : index
    %c0_4 = arith.constant 0 : index
    %c0_5 = arith.constant 0 : index
    %c0_6 = arith.constant 0 : index
    %2 = vector.load %arg2[%c0_3, %c0_4, %c0_5, %c0_6] : memref<1x1x16x4xf32, #tpu.memory_space<vmem>>, vector<1x1x16x4xf32>
    %3 = vector.shape_cast %2 : vector<1x1x16x4xf32> to vector<16x4xf32>
    %c0_i32 = arith.constant 0 : i32
    %4 = arith.cmpi eq, %arg1, %c0_i32 : i32
    %cst = arith.constant 0.000000e+00 : f32
    %cst_7 = arith.constant 1.000000e+00 : f32
    %5 = arith.select %4, %cst, %cst_7 : f32
    %6 = vector.broadcast %5 : f32 to vector<16x4xf32>
    %7 = arith.mulf %3, %6 : vector<16x4xf32>
    %c0_8 = arith.constant 0 : index
    %c0_9 = arith.constant 0 : index
    %c0_10 = arith.constant 0 : index
    %c0_11 = arith.constant 0 : index
    %8 = vector.load %arg4[%c0_8, %c0_9, %c0_10, %c0_11] : memref<1x1x16x4xf32, #tpu.memory_space<vmem>>, vector<1x1x16x4xf32>
    %9 = vector.shape_cast %8 : vector<1x1x16x4xf32> to vector<16x4xf32>
    %c0_i32_12 = arith.constant 0 : i32
    %10 = arith.cmpi eq, %arg1, %c0_i32_12 : i32
    %cst_13 = arith.constant 0.000000e+00 : f32
    %cst_14 = arith.constant 1.000000e+00 : f32
    %11 = arith.select %10, %cst_13, %cst_14 : f32
    %12 = vector.broadcast %11 : f32 to vector<16x4xf32>
    %13 = arith.mulf %9, %12 : vector<16x4xf32>
    %14 = vector.shape_cast %7 : vector<16x4xf32> to vector<1x16x4xf32>
    %15 = vector.shape_cast %13 : vector<16x4xf32> to vector<1x16x4xf32>
    %16 = tpu.concatenate %14, %1, %15 in 0 : vector<1x16x4xf32>, vector<16x16x4xf32>, vector<1x16x4xf32> -> vector<18x16x4xf32>
    %cst_15 = arith.constant 0.000000e+00 : f32
    %17 = vector.broadcast %cst_15 : f32 to vector<18x1x4xf32>
    %18 = vector.extract_strided_slice %16 {offsets = [0, 0, 0], sizes = [18, 15, 4], strides = [1, 1, 1]} : vector<18x16x4xf32> to vector<18x15x4xf32>
    %19 = tpu.concatenate %17, %18 in 1 : vector<18x1x4xf32>, vector<18x15x4xf32> -> vector<18x16x4xf32>
    %20 = vector.extract_strided_slice %16 {offsets = [0, 1, 0], sizes = [18, 15, 4], strides = [1, 1, 1]} : vector<18x16x4xf32> to vector<18x15x4xf32>
    %21 = tpu.concatenate %20, %17 in 1 : vector<18x15x4xf32>, vector<18x1x4xf32> -> vector<18x16x4xf32>
    %22 = vector.extract_strided_slice %19 {offsets = [0, 0, 0], sizes = [16, 16, 4], strides = [1, 1, 1]} : vector<18x16x4xf32> to vector<16x16x4xf32>
    %23 = vector.extract_strided_slice %16 {offsets = [0, 0, 0], sizes = [16, 16, 4], strides = [1, 1, 1]} : vector<18x16x4xf32> to vector<16x16x4xf32>
    %24 = vector.extract_strided_slice %21 {offsets = [0, 0, 0], sizes = [16, 16, 4], strides = [1, 1, 1]} : vector<18x16x4xf32> to vector<16x16x4xf32>
    %25 = vector.extract_strided_slice %19 {offsets = [1, 0, 0], sizes = [16, 16, 4], strides = [1, 1, 1]} : vector<18x16x4xf32> to vector<16x16x4xf32>
    %26 = vector.extract_strided_slice %16 {offsets = [1, 0, 0], sizes = [16, 16, 4], strides = [1, 1, 1]} : vector<18x16x4xf32> to vector<16x16x4xf32>
    %27 = vector.extract_strided_slice %21 {offsets = [1, 0, 0], sizes = [16, 16, 4], strides = [1, 1, 1]} : vector<18x16x4xf32> to vector<16x16x4xf32>
    %28 = vector.extract_strided_slice %19 {offsets = [2, 0, 0], sizes = [16, 16, 4], strides = [1, 1, 1]} : vector<18x16x4xf32> to vector<16x16x4xf32>
    %29 = vector.extract_strided_slice %16 {offsets = [2, 0, 0], sizes = [16, 16, 4], strides = [1, 1, 1]} : vector<18x16x4xf32> to vector<16x16x4xf32>
    %30 = vector.extract_strided_slice %21 {offsets = [2, 0, 0], sizes = [16, 16, 4], strides = [1, 1, 1]} : vector<18x16x4xf32> to vector<16x16x4xf32>
    %31 = tpu.concatenate %22, %23, %24, %25, %26, %27, %28, %29, %30 in 2 : vector<16x16x4xf32>, vector<16x16x4xf32>, vector<16x16x4xf32>, vector<16x16x4xf32>, vector<16x16x4xf32>, vector<16x16x4xf32>, vector<16x16x4xf32>, vector<16x16x4xf32>, vector<16x16x4xf32> -> vector<16x16x36xf32>
    %32 = vector.shape_cast %31 : vector<16x16x36xf32> to vector<256x36xf32>
    %33 = arith.truncf %32 : vector<256x36xf32> to vector<256x36xbf16>
    %c0_16 = arith.constant 0 : index
    %c0_17 = arith.constant 0 : index
    %34 = vector.load %arg5[%c0_16, %c0_17] : memref<36x128xbf16, #tpu.memory_space<vmem>>, vector<36x128xbf16>
    %cst_18 = arith.constant dense<0.000000e+00> : vector<256x128xf32>
    %35 = tpu.matmul %33, %34, %cst_18 {dimension_numbers = #tpu.dot_dimension_numbers<[1], [0], [0], [1], [0, 0, 1, 1], [], []>} : vector<256x36xbf16>, vector<36x128xbf16>, vector<256x128xf32> -> vector<256x128xf32>
    %cst_19 = arith.constant dense<0.000000e+00> : vector<128xf32>
    %36 = vector.multi_reduction <add>, %35, %cst_19 [0] : vector<256x128xf32> to vector<128xf32>
    %37 = vector.shape_cast %36 : vector<128xf32> to vector<1x128xf32>
    %cst_20 = arith.constant 2.560000e+02 : f32
    %38 = vector.broadcast %cst_20 : f32 to vector<1x128xf32>
    %39 = arith.divf %37, %38 : vector<1x128xf32>
    %40 = vector.broadcast %39 : vector<1x128xf32> to vector<256x128xf32>
    %41 = arith.subf %35, %40 : vector<256x128xf32>
    %42 = arith.mulf %41, %41 : vector<256x128xf32>
    %cst_21 = arith.constant dense<0.000000e+00> : vector<128xf32>
    %43 = vector.multi_reduction <add>, %42, %cst_21 [0] : vector<256x128xf32> to vector<128xf32>
    %44 = vector.shape_cast %43 : vector<128xf32> to vector<1x128xf32>
    %c0_22 = arith.constant 0 : index
    %c0_23 = arith.constant 0 : index
    %c0_24 = arith.constant 0 : index
    %c0_25 = arith.constant 0 : index
    %45 = vector.load %arg6[%c0_22, %c0_23, %c0_24, %c0_25] : memref<1x1x2x128xf32, #tpu.memory_space<vmem>>, vector<1x1x1x128xf32>
    %46 = vector.shape_cast %45 : vector<1x1x1x128xf32> to vector<1x128xf32>
    %47 = vector.shape_cast %37 : vector<1x128xf32> to vector<1x1x1x128xf32>
    tpu.vector_store %arg6[%c0_22, %c0_23, %c0_24, %c0_25], %47 {strides = array<i32>} : memref<1x1x2x128xf32, #tpu.memory_space<vmem>>, vector<1x1x1x128xf32>,
    %c0_26 = arith.constant 0 : index
    %c0_27 = arith.constant 0 : index
    %c1 = arith.constant 1 : index
    %c0_28 = arith.constant 0 : index
    %48 = vector.load %arg6[%c0_26, %c0_27, %c1, %c0_28] : memref<1x1x2x128xf32, #tpu.memory_space<vmem>>, vector<1x1x1x128xf32>
    %49 = vector.shape_cast %48 : vector<1x1x1x128xf32> to vector<1x128xf32>
    %50 = vector.shape_cast %44 : vector<1x128xf32> to vector<1x1x1x128xf32>
    tpu.vector_store %arg6[%c0_26, %c0_27, %c1, %c0_28], %50 {strides = array<i32>} : memref<1x1x2x128xf32, #tpu.memory_space<vmem>>, vector<1x1x1x128xf32>,
    return
  }
  func.func @transform_0(%arg0: i32, %arg1: i32) -> (i32, i32, i32, i32) {
    %c16_i32 = arith.constant 16 : i32
    %0 = arith.muli %arg1, %c16_i32 : i32
    %c1_i32 = arith.constant 1 : i32
    %1 = arith.subi %0, %c1_i32 : i32
    %c0_i32 = arith.constant 0 : i32
    %2 = arith.maxsi %1, %c0_i32 : i32
    %c0_i32_0 = arith.constant 0 : i32
    %c0_i32_1 = arith.constant 0 : i32
    %c0_i32_2 = arith.constant 0 : i32
    return %arg0, %2, %c0_i32_0, %c0_i32_1 : i32, i32, i32, i32
  }
  func.func @transform_1(%arg0: i32, %arg1: i32) -> (i32, i32, i32, i32) {
    %c0_i32 = arith.constant 0 : i32
    %c0_i32_0 = arith.constant 0 : i32
    %c0_i32_1 = arith.constant 0 : i32
    return %arg0, %arg1, %c0_i32, %c0_i32_0 : i32, i32, i32, i32
  }
  func.func @transform_2(%arg0: i32, %arg1: i32) -> (i32, i32, i32, i32) {
    %c16_i32 = arith.constant 16 : i32
    %0 = arith.muli %arg1, %c16_i32 : i32
    %c16_i32_0 = arith.constant 16 : i32
    %1 = arith.addi %0, %c16_i32_0 : i32
    %c15_i32 = arith.constant 15 : i32
    %2 = arith.minsi %1, %c15_i32 : i32
    %c0_i32 = arith.constant 0 : i32
    %c0_i32_1 = arith.constant 0 : i32
    %c0_i32_2 = arith.constant 0 : i32
    return %arg0, %2, %c0_i32, %c0_i32_1 : i32, i32, i32, i32
  }
  func.func @transform_3(%arg0: i32, %arg1: i32) -> (i32, i32) {
    %c0_i32 = arith.constant 0 : i32
    %c0_i32_0 = arith.constant 0 : i32
    %c0_i32_1 = arith.constant 0 : i32
    return %c0_i32, %c0_i32_0 : i32, i32
  }
  func.func @transform_4(%arg0: i32, %arg1: i32) -> (i32, i32, i32, i32) {
    %c0_i32 = arith.constant 0 : i32
    %c0_i32_0 = arith.constant 0 : i32
    %c0_i32_1 = arith.constant 0 : i32
    return %arg0, %arg1, %c0_i32, %c0_i32_0 : i32, i32, i32, i32
  }
}

</mosaic_0001>

<bundles_post_ra>
// kernel: tpu_custom_call.1
= control target key start
LH: loop header
LB: loop body
LE: loop exit
PB: predicated region body
PF: predicated region fallthrough
CT: control target
= control target key end

     0   :  { %9 = vsyncpa [#allocation3], 0  ;;  %s4719_s0 = inlined_call_operand.vmem [shape: f32[2,16,16,4], index: 0, kind: input, shape index: {}]   ;;  %s4720_s1 = inlined_call_operand.vmem [shape: f32[2,16,16,4], index: 1, kind: input, shape index: {}]   ;;  %s4721_s2 = inlined_call_operand.vmem [shape: f32[2,16,16,4], index: 2, kind: input, shape index: {}]   ;;  %s4722_s3 = inlined_call_operand.vmem [shape: bf16[36,128], index: 3, kind: input, shape index: {}]   ;;  %s4723_s4 = inlined_call_operand.hbm [shape: f32[2,1,2,128], index: 4, kind: output, shape index: {}]  }
   0x1   :  { %11 = vsyncpa [#allocation3 + $0x1], 0  ;;  %s3058_s15 = smov 0   ;;  %s3060_s16 = smov 0  }
   0x2   :  { %s3062_s17 = smov 0   ;;  %s3064_s18 = smov 0  }
   0x3   :  { %s3066_s19 = smov 0   ;;  %s3068_s20 = smov 0  }
   0x4 LB: > { %s2160_s21 = sadd.s32 4294967295, %s3022_s20   ;;  %s2161_s22 = sadd.s32 4294967294, %s3022_s20   ;;  %s3022_s20 = sphi %s3068_s20, %s17_s20   ;;  %s3018_s19 = sphi %s3066_s19, %s4866_s19   ;;  %s3014_s18 = sphi %s3064_s18, %s4865_s18   ;;  %s3010_s17 = sphi %s3062_s17, %s4864_s17   ;;  %s3006_s16 = sphi %s3060_s16, %s4863_s16   ;;  %s3002_s15 = sphi %s3058_s15, %s4862_s15  }
   0x5   : > { %s29_s23 = sadd.s32 1, %s3018_s19  ;;  %s159_s24 = sadd.s32 1, %s3010_s17 }
   0x6   : > { %p31_p0 = scmp.ge.s32.totalorder %s29_s23, 2  ;;  %p169_p1 = scmp.ne.s32.totalorder %s3010_s17, %s3006_s16 }
   0x7   : > { %p170_p2 = scmp.eq.s32.totalorder %s2160_s21, 1  ;;  %p175_p3 = scmp.ne.s32.totalorder %s3006_s16, %s3002_s15 }
   0x8   : > { %s4868_s23 = smov (%p31_p0, %s29_s23), 0  ;;  %p176_p5 = scmp.eq.s32.totalorder %s2161_s22, 1 }
   0x9   : > { %p3098_p4 = por %p170_p2, %p169_p1  ;;  %s154_s26 = ssub.s32 %s3018_s19, %s4868_s23 }
   0xa   : > { %p2164_p6 = scmp.ge.s32.totalorder %s3022_s20, 1  ;;  %p157_p7 = scmp.eq.s32.totalorder %s154_s26, 0 }
   0xb   : > { %p3105_p8 = por %p176_p5, %p175_p3  ;;  %p251_p9 = scmp.lt.s32.totalorder %s3022_s20, 3 }
   0xc   : > { %s3111_s28 = scalar_select %p157_p7, %s3010_s17, %s159_s24  }
   0xd   : > { %p252_p10 = pnand %p2164_p6, %p251_p9 }
   0xf   : > { %255 = sbr.rel (%p252_p10) target bundleno = 731 (0x2db), region = 36 }
  0x14   : > { %p312_p11 = scmp.lt.s32.totalorder %s3014_s18, 1  ;;  %s3024_s11 = smov 4   ;;  %vm540_vm0 = vcmask 1046528   ;;  %vm433_vm1 = vcmask 1040384   ;;  %vm1434_vm2 = vcmask 31744   ;;  %vm1467_vm3 = vcmask 64512  }
  0x15   : > { %s3025_s12 = smov 8   ;;  %s3026_s13 = smov 12   ;;  %vm1500_vm4 = vcmask 97280   ;;  %vm1533_vm5 = vcmask 130048   ;;  %vm1783_vm6 = vcmask 1041408   ;;  %vm1566_vm7 = vcmask 162816  }
  0x16   : > { %s313_s29 = scalar_select %p312_p11, %s3014_s18, 1  ;;  %vm1599_vm8 = vcmask 195584   ;;  %vm1632_vm9 = vcmask 228352   ;;  %vm1665_vm10 = vcmask 261120   ;;  %vm1734_vm11 = vcmask 293888  }
  0x17   : > { %s3027_s14 = smov 16   ;;  %s3028_s21 = smov 20  }
  0x18   : > { %s3115_s30 = sshll.u32 %s313_s29, 8  ;;  %s3029_s22 = smov 28  }
  0x19   : > { %s3121_s7 = scalar_lea.vmem %s4720_s1, %s3115_s30  ;;  %s320_s10 = scalar_lea.vmem %s4719_s0, %s3115_s30 }
  0x1a   : > { %v3124_v0 = vld [vmem:[%s3121_s7 + $0x30] sm:$0xff]  ;;  %v3127_v1 = vld [vmem:[%s3121_s7 + $0x38] sm:$0xff]  ;;  %v3144_v5 = vld [vmem:[%s3121_s7] sm:$0xff]  ;;  %s3030_s24 = smov 24   ;;  %s3031_s26 = smov 32  }
  0x1b   : > { %v3130_v2 = vld [vmem:[%s3121_s7 + $0x10] sm:$0xff]  ;;  %v3138_v3 = vpack.i.bf16 %v3127_v1, %v3124_v0  ;;  %v3141_v4 = vld [vmem:[%s3121_s7 + $0x18] sm:$0xff]  ;;  %v3147_v6 = vld [vmem:[%s3121_s7 + $0x8] sm:$0xff]  ;;  %v544_v45 = vrot.slane %v3144_v5, 1  ;;  %v553_v60 = vrot.slane %v3124_v0, 1  ;;  %v554_v61 = vrot.slane %v3127_v1, 1 }
  0x1c   : > { %v3151_v7 = vpack.i.bf16 %v3141_v4, %v3130_v2  ;;  %v3155_v8 = vpack.i.bf16 %v3147_v6, %v3144_v5  ;;  %v386_v9 = vld [vmem:[%s320_s10] sm:$0xff]  ;;  %v387_v10 = vld [vmem:[%s320_s10 + $0x8] sm:$0xff]  ;;  %v3192_v20 = vld [vmem:[%s3121_s7 + $0x70] sm:$0xff]  ;;  %v545_v46 = vrot.slane %v3147_v6, 1  ;;  %v547_v62 = vrot.slane %v3130_v2, 1 }
  0x1d   : > { %2296 = vrot.lane.b32.xlu2 %v3138_v3, %s3024_s11  ;;  %v3164_v11 = vld [vmem:[%s3121_s7 + $0x40] sm:$0xff]  ;;  %v3167_v12 = vld [vmem:[%s3121_s7 + $0x48] sm:$0xff]  ;;  %v3169_v13 = vmul.f32 0.0, %v386_v9  ;;  %v3171_v14 = vmul.f32 0.0, %v387_v10  ;;  %v3198_v21 = vld [vmem:[%s3121_s7 + $0x78] sm:$0xff]  ;;  %v548_v63 = vrot.slane %v3141_v4, 1 }
  0x1e   : > { %2286 = vrot.lane.b32.xlu1 %v3151_v7, %s3024_s11  ;;  %2281 = vrot.lane.b32.xlu0 %v3155_v8, %s3024_s11  ;;  %v3174_v15 = vld [vmem:[%s3121_s7 + $0x20] sm:$0xff]  ;;  %v3177_v16 = vld [vmem:[%s3121_s7 + $0x28] sm:$0xff]  ;;  %v3181_v17 = vpack.i.bf16 %v3167_v12, %v3164_v11  ;;  %v3214_v26 = vpack.i.bf16 %v3198_v21, %v3192_v20  ;;  %v546_v51 = vsel %vm540_vm0, %v544_v45, %v545_v46  ;;  %v614_v52 = vsel %vm540_vm0, %v545_v46, 0.0 }
  0x1f   : > { %v3185_v18 = vpack.i.bf16 %v3177_v16, %v3174_v15  ;;  %v2305_v19 = vpack.i.bf16 %v3171_v14, %v3169_v13  ;;  %v3201_v22 = vld [vmem:[%s3121_s7 + $0x60] sm:$0xff]  ;;  %v3204_v23 = vld [vmem:[%s3121_s7 + $0x68] sm:$0xff]  ;;  %v3207_v24 = vld [vmem:[%s3121_s7 + $0x50] sm:$0xff]  ;;  %v541_v49 = vrot.slane %v3169_v13, 1  ;;  %v542_v50 = vrot.slane %v3171_v14, 1 }
  0x20   : > { %v3210_v25 = vld [vmem:[%s3121_s7 + $0x58] sm:$0xff]  ;;  %v3218_v27 = vpack.i.bf16 %v3204_v23, %v3201_v22  ;;  %v3227_v29 = vld [vmem:[%s3121_s7 + $0xa0] sm:$0xff]  ;;  %v3234_v30 = vld [vmem:[%s3121_s7 + $0xa8] sm:$0xff]  ;;  %v3316_v57 = vpack.i.bf16 %v614_v52, %v546_v51  ;;  %v550_v9 = vrot.slane %v3174_v15, 1  ;;  %v551_v10 = vrot.slane %v3177_v16, 1 }
  0x21   : > { %4777 = vst [vmem:[#allocation5_spill] sm:$0xff] %v3185_v18  ;;  %v3222_v28 = vpack.i.bf16 %v3210_v25, %v3207_v24  ;;  %v3237_v31 = vld [vmem:[%s3121_s7 + $0x90] sm:$0xff]  ;;  %v3240_v32 = vld [vmem:[%s3121_s7 + $0x98] sm:$0xff]  ;;  %v3243_v33 = vld [vmem:[%s3121_s7 + $0x80] sm:$0xff]  ;;  %v3250_v35 = vpack.i.bf16 %v3234_v30, %v3227_v29  ;;  %v543_v55 = vsel %vm540_vm0, %v541_v49, %v542_v50  ;;  %v613_v56 = vsel %vm540_vm0, %v542_v50, 0.0 }
  0x22   : > { %v3246_v34 = vld [vmem:[%s3121_s7 + $0x88] sm:$0xff]  ;;  %v3254_v36 = vpack.i.bf16 %v3240_v32, %v3237_v31  ;;  %v3263_v38 = vld [vmem:[%s3121_s7 + $0xd0] sm:$0xff]  ;;  %v3270_v39 = vld [vmem:[%s3121_s7 + $0xd8] sm:$0xff]  ;;  %4778 = vst [vmem:[#allocation6_spill] sm:$0xff] %v3316_v57  ;;  %v2360_v59 = vpack.i.bf16 %v613_v56, %v543_v55  ;;  %v617_v45 = vsel %vm540_vm0, %v554_v61, 0.0  ;;  %v549_v46 = vsel %vm540_vm0, %v547_v62, %v548_v63 }
  0x23   : > { %v3258_v37 = vpack.i.bf16 %v3246_v34, %v3243_v33  ;;  %v3273_v40 = vld [vmem:[%s3121_s7 + $0xc0] sm:$0xff]  ;;  %v3276_v41 = vld [vmem:[%s3121_s7 + $0xc8] sm:$0xff]  ;;  %v3279_v42 = vld [vmem:[%s3121_s7 + $0xb0] sm:$0xff]  ;;  %v3286_v44 = vpack.i.bf16 %v3270_v39, %v3263_v38  ;;  %v615_v49 = vsel %vm540_vm0, %v548_v63, 0.0  ;;  %v3338_v50 = vsel %vm540_vm0, %v550_v9, %v551_v10 }
  0x24   : > { %v3282_v43 = vld [vmem:[%s3121_s7 + $0xb8] sm:$0xff]  ;;  %v3292_v47 = vpack.i.bf16 %v3276_v41, %v3273_v40  ;;  %v3309_v53 = vld [vmem:[%s3121_s7 + $0xe0] sm:$0xff]  ;;  %v3312_v54 = vld [vmem:[%s3121_s7 + $0xe8] sm:$0xff]  ;;  %4779 = vst [vmem:[#allocation7_spill] sm:$0xff] %v3338_v50  ;;  %v3341_v51 = vsel %vm540_vm0, %v551_v10, 0.0  ;;  %v3345_v55 = vpack.i.bf16 %v615_v49, %v549_v46  ;;  %v557_v62 = vrot.slane %v3167_v12, 1 }
  0x25   : > { %2301 = vrot.lane.b32.xlu2 %v3181_v17, %s3024_s11  ;;  %v3296_v48 = vpack.i.bf16 %v3282_v43, %v3279_v42  ;;  %v3320_v58 = vpack.i.bf16 %v3312_v54, %v3309_v53  ;;  %4780 = vst [vmem:[#allocation8_spill] sm:$0xff] %v3341_v51  ;;  %v3349_v56 = vpack.i.bf16 %v3341_v51, %v3338_v50  ;;  %v559_v63 = vrot.slane %v3207_v24, 1 }
  0x26   : > { %2291 = vrot.lane.b32.xlu1 %v3185_v18, %s3024_s11  ;;  %2306 = vrot.lane.b32.xlu0 %v2305_v19, %s3024_s11  ;;  %v555_v19 = vsel %vm540_vm0, %v553_v60, %v554_v61  ;;  %v563_v60 = vrot.slane %v3204_v23, 1  ;;  %v556_v61 = vrot.slane %v3164_v11, 1  ;;  %v560_v9 = vrot.slane %v3210_v25, 1 }
  0x27   : > { %v3343_v52 = vpack.i.bf16 %v617_v45, %v555_v19  ;;  %4782 = vst [vmem:[#allocation10_spill] sm:$0xff] %v3349_v56  ;;  %v3369_v46 = vsel %vm540_vm0, %v557_v62, 0.0  ;;  %v565_v50 = vrot.slane %v3192_v20, 1 }
  0x28   : > { %v620_v19 = vsel %vm540_vm0, %v563_v60, 0.0  ;;  %v3366_v45 = vsel %vm540_vm0, %v556_v61, %v557_v62  ;;  %4784 = vst [vmem:[#allocation12_spill] sm:$0xff] %v3369_v46  ;;  %v561_v49 = vsel %vm540_vm0, %v559_v63, %v560_v9  ;;  %v572_v61 = vrot.slane %v3240_v32, 1 }
  0x29   : > { %4781 = vst [vmem:[#allocation9_spill] sm:$0xff] %v3343_v52  ;;  %v566_v62 = vrot.slane %v3198_v21, 1  ;;  %v568_v63 = vrot.slane %v3243_v33, 1 }
  0x2a   : > { %4783 = vst [vmem:[#allocation11_spill] sm:$0xff] %v3366_v45 }
  0x2d   : > { %2321 = vrot.lane.b32.xlu2 %v3214_v26, %s3024_s11 }
  0x2e   : > { %2316 = vrot.lane.b32.xlu1 %v3218_v27, %s3024_s11  ;;  %2311 = vrot.lane.b32.xlu0 %v3222_v28, %s3024_s11 }
  0x35   : > { %2336 = vrot.lane.b32.xlu2 %v3250_v35, %s3024_s11 }
  0x36   : > { %2331 = vrot.lane.b32.xlu1 %v3254_v36, %s3024_s11  ;;  %2326 = vrot.lane.b32.xlu0 %v3258_v37, %s3024_s11 }
  0x3d   : > { %2351 = vrot.lane.b32.xlu2 %v3286_v44, %s3024_s11 }
  0x3e   : > { %2346 = vrot.lane.b32.xlu1 %v3292_v47, %s3024_s11  ;;  %2341 = vrot.lane.b32.xlu0 %v3296_v48, %s3024_s11 }
  0x45   : > { %2366 = vrot.lane.b32.xlu2 %v3316_v57, %s3025_s12 }
  0x46   : > { %2356 = vrot.lane.b32.xlu0 %v3320_v58, %s3024_s11  ;;  %2361 = vrot.lane.b32.xlu1 %v2360_v59, %s3025_s12  ;;  %v562_v59 = vrot.slane %v3201_v22, 1  ;;  %s2203_s11 = sadd.s32 240, %s3115_s30  ;;  %s2964_s30 = scalar_lea.hbm %s4723_s4, 4 }
  0x48   : > { %v564_v10 = vsel %vm540_vm0, %v562_v59, %v563_v60  ;;  %v3377_v59 = vpack.i.bf16 %v3369_v46, %v3366_v45 }
  0x49   : > { %v3373_v51 = vpack.i.bf16 %v620_v19, %v564_v10  ;;  %v567_v19 = vsel %vm540_vm0, %v565_v50, %v566_v62  ;;  %v581_v50 = vrot.slane %v3276_v41, 1 }
  0x4a   : > { %4786 = vst [vmem:[#allocation14_spill] sm:$0xff] %v3377_v59 }
  0x4b   : > { %4785 = vst [vmem:[#allocation13_spill] sm:$0xff] %v3373_v51 }
  0x4d   : > { %2381 = vrot.lane.b32.xlu2 %v3343_v52, %s3025_s12  ;;  %v619_v52 = vsel %vm540_vm0, %v560_v9, 0.0  ;;  %v569_v9 = vrot.slane %v3246_v34, 1 }
  0x4e   : > { %2371 = vrot.lane.b32.xlu0 %v3345_v55, %s3025_s12  ;;  %2376 = vrot.lane.b32.xlu1 %v3349_v56, %s3025_s12  ;;  %v3379_v60 = vpack.i.bf16 %v619_v52, %v561_v49  ;;  %v571_v56 = vrot.slane %v3237_v31, 1  ;;  %v623_v52 = vsel %vm540_vm0, %v572_v61, 0.0  ;;  %v621_v49 = vsel %vm540_vm0, %v566_v62, 0.0 }
  0x4f   : > { %v3398_v46 = vsel %vm540_vm0, %v568_v63, %v569_v9  ;;  %v3401_v45 = vsel %vm540_vm0, %v569_v9, 0.0  ;;  %v574_v62 = vrot.slane %v3227_v29, 1  ;;  %v575_v63 = vrot.slane %v3234_v30, 1 }
  0x50   : > { %4787 = vst [vmem:[#allocation15_spill] sm:$0xff] %v3379_v60  ;;  %v573_v10 = vsel %vm540_vm0, %v571_v56, %v572_v61  ;;  %v3405_v56 = vpack.i.bf16 %v621_v49, %v567_v19  ;;  %v3409_v61 = vpack.i.bf16 %v3401_v45, %v3398_v46  ;;  %v578_v9 = vrot.slane %v3282_v43, 1 }
  0x51   : > { %4788 = vst [vmem:[#allocation16_spill] sm:$0xff] %v3398_v46  ;;  %v576_v19 = vsel %vm540_vm0, %v574_v62, %v575_v63  ;;  %v624_v49 = vsel %vm540_vm0, %v575_v63, 0.0  ;;  %v584_v62 = vrot.slane %v3270_v39, 1  ;;  %v586_v63 = vrot.slane %v3309_v53, 1 }
  0x52   : > { %4789 = vst [vmem:[#allocation17_spill] sm:$0xff] %v3401_v45  ;;  %v625_v46 = vsel %vm540_vm0, %v578_v9, 0.0 }
  0x53   : > { %4791 = vst [vmem:[#allocation19_spill] sm:$0xff] %v3405_v56 }
  0x54   : > { %4792 = vst [vmem:[#allocation20_spill] sm:$0xff] %v3409_v61 }
  0x55   : > { %2396 = vrot.lane.b32.xlu2 %v3373_v51, %s3025_s12  ;;  %v3403_v51 = vpack.i.bf16 %v623_v52, %v573_v10  ;;  %v626_v52 = vsel %vm540_vm0, %v581_v50, 0.0 }
  0x56   : > { %2386 = vrot.lane.b32.xlu0 %v3377_v59, %s3025_s12  ;;  %2391 = vrot.lane.b32.xlu1 %v3379_v60, %s3025_s12  ;;  %v580_v59 = vrot.slane %v3273_v40, 1  ;;  %v577_v60 = vrot.slane %v3279_v42, 1 }
  0x57   : > { %4790 = vst [vmem:[#allocation18_spill] sm:$0xff] %v3403_v51 }
  0x58   : > { %v582_v10 = vsel %vm540_vm0, %v580_v59, %v581_v50  ;;  %v579_v45 = vsel %vm540_vm0, %v577_v60, %v578_v9  ;;  %v438_v59 = vrot.slane %v3147_v6, 7  ;;  %v583_v50 = vrot.slane %v3263_v38, 1 }
  0x59   : > { %v3429_v57 = vpack.i.bf16 %v626_v52, %v582_v10  ;;  %v587_v60 = vrot.slane %v3312_v54, 1 }
  0x5b   : > { %4793 = vst [vmem:[#allocation21_spill] sm:$0xff] %v3429_v57  ;;  %v588_v9 = vsel %vm540_vm0, %v586_v63, %v587_v60  ;;  %v628_v10 = vsel %vm540_vm0, %v587_v60, 0.0  ;;  %v444_v63 = vrot.slane %v3177_v16, 7 }
  0x5d   : > { %2411 = vrot.lane.b32.xlu2 %v3403_v51, %s3025_s12  ;;  %v3431_v51 = vpack.i.bf16 %v624_v49, %v576_v19  ;;  %v3461_v49 = vpack.i.bf16 %v628_v10, %v588_v9  ;;  %v456_v9 = vrot.slane %v3204_v23, 7  ;;  %v449_v10 = vrot.slane %v3164_v11, 7 }
  0x5e   : > { %2401 = vrot.lane.b32.xlu0 %v3405_v56, %s3025_s12  ;;  %2406 = vrot.lane.b32.xlu1 %v3409_v61, %s3025_s12  ;;  %v3433_v56 = vpack.i.bf16 %v625_v46, %v579_v45  ;;  %v437_v61 = vrot.slane %v3144_v5, 7  ;;  %v585_v45 = vsel %vm540_vm0, %v583_v50, %v584_v62  ;;  %v627_v46 = vsel %vm540_vm0, %v584_v62, 0.0 }
  0x5f   : > { %4794 = vst [vmem:[#allocation22_spill] sm:$0xff] %v3431_v51  ;;  %v3459_v19 = vpack.i.bf16 %v627_v46, %v585_v45  ;;  %v441_v50 = vrot.slane %v3141_v4, 7  ;;  %v443_v62 = vrot.slane %v3174_v15, 7 }
  0x60   : > { %4795 = vst [vmem:[#allocation23_spill] sm:$0xff] %v3433_v56  ;;  %v3448_v5 = vsel %vm433_vm1, %v437_v61, %v438_v59  ;;  %v3451_v6 = vsel %vm433_vm1, 0.0, %v437_v61  ;;  %v446_v59 = vrot.slane %v3124_v0, 7  ;;  %v447_v61 = vrot.slane %v3127_v1, 7 }
  0x61   : > { %v2440_v52 = vpack.i.bf16 %v3448_v5, %v3451_v6  ;;  %4796 = vst [vmem:[#allocation24_spill] sm:$0xff] %v3459_v19  ;;  %v3487_v15 = vsel %vm433_vm1, %v443_v62, %v444_v63  ;;  %v3490_v16 = vsel %vm433_vm1, 0.0, %v443_v62 }
  0x62   : > { %4797 = vst [vmem:[#allocation25_spill] sm:$0xff] %v3461_v49  ;;  %v3475_v0 = vsel %vm433_vm1, %v446_v59, %v447_v61  ;;  %v3478_v1 = vsel %vm433_vm1, 0.0, %v446_v59  ;;  %v3502_v46 = vpack.i.bf16 %v3487_v15, %v3490_v16  ;;  %v452_v59 = vrot.slane %v3207_v24, 7 }
  0x63   : > { %v3494_v60 = vpack.i.bf16 %v3475_v0, %v3478_v1  ;;  %v453_v61 = vrot.slane %v3210_v25, 7  ;;  %v3528_v24 = vsel %vm433_vm1, 0.0, %v449_v10 }
  0x65   : > { %2426 = vrot.lane.b32.xlu2 %v3429_v57, %s3025_s12  ;;  %4798 = vst [vmem:[#allocation26_spill] sm:$0xff] %v3494_v60  ;;  %v3531_v25 = vsel %vm433_vm1, %v452_v59, %v453_v61  ;;  %v461_v61 = vrot.slane %v3243_v33, 7  ;;  %v471_v57 = vrot.slane %v3282_v43, 7 }
  0x66   : > { %2416 = vrot.lane.b32.xlu0 %v3431_v51, %s3025_s12  ;;  %2421 = vrot.lane.b32.xlu1 %v3433_v56, %s3025_s12  ;;  %v440_v56 = vrot.slane %v3130_v2, 7  ;;  %v468_v51 = vrot.slane %v3234_v30, 7 }
  0x68   : > { %v3481_v2 = vsel %vm433_vm1, %v440_v56, %v441_v50  ;;  %v3484_v4 = vsel %vm433_vm1, 0.0, %v440_v56  ;;  %v455_v56 = vrot.slane %v3201_v22, 7  ;;  %v3534_v50 = vsel %vm433_vm1, 0.0, %v452_v59 }
  0x69   : > { %v3498_v45 = vpack.i.bf16 %v3481_v2, %v3484_v4  ;;  %v459_v59 = vrot.slane %v3198_v21, 7 }
  0x6a   : > { %v3517_v22 = vsel %vm433_vm1, %v455_v56, %v456_v9  ;;  %v3520_v11 = vsel %vm433_vm1, 0.0, %v455_v56  ;;  %v3546_v56 = vpack.i.bf16 %v3531_v25, %v3534_v50  ;;  %v464_v9 = vrot.slane %v3237_v31, 7 }
  0x6b   : > { %v3538_v62 = vpack.i.bf16 %v3517_v22, %v3520_v11 }
  0x6c   : > { %4801 = vst [vmem:[#allocation29_spill] sm:$0xff] %v3546_v56 }
  0x6d   : > { %2441 = vrot.lane.b32.xlu2 %v2440_v52, %s3026_s13  ;;  %v450_v52 = vrot.slane %v3167_v12, 7  ;;  %4799 = vst [vmem:[#allocation27_spill] sm:$0xff] %v3538_v62 }
  0x6e   : > { %2431 = vrot.lane.b32.xlu0 %v3459_v19, %s3025_s12  ;;  %2436 = vrot.lane.b32.xlu1 %v3461_v49, %s3025_s12  ;;  %v462_v49 = vrot.slane %v3246_v34, 7  ;;  %v470_v19 = vrot.slane %v3279_v42, 7 }
  0x6f   : > { %v3525_v23 = vsel %vm433_vm1, %v449_v10, %v450_v52  ;;  %v465_v10 = vrot.slane %v3240_v32, 7  ;;  %v458_v52 = vrot.slane %v3192_v20, 7  ;;  %v3564_v20 = vsel %vm433_vm1, 0.0, %v464_v9 }
  0x70   : > { %v3542_v63 = vpack.i.bf16 %v3525_v23, %v3528_v24  ;;  %v3575_v34 = vsel %vm433_vm1, %v461_v61, %v462_v49  ;;  %v474_v49 = vrot.slane %v3276_v41, 7  ;;  %v3619_v43 = vsel %vm433_vm1, %v470_v19, %v471_v57 }
  0x71   : > { %v3561_v31 = vsel %vm433_vm1, %v464_v9, %v465_v10  ;;  %v3569_v32 = vsel %vm433_vm1, %v458_v52, %v459_v59  ;;  %v3572_v33 = vsel %vm433_vm1, 0.0, %v458_v52  ;;  %v473_v52 = vrot.slane %v3273_v40, 7  ;;  %4805 = vst [vmem:[#allocation33_spill] sm:$0xff] %v3619_v43 }
  0x72   : > { %4800 = vst [vmem:[#allocation28_spill] sm:$0xff] %v3542_v63  ;;  %v3582_v10 = vpack.i.bf16 %v3561_v31, %v3564_v20  ;;  %v3586_v9 = vpack.i.bf16 %v3569_v32, %v3572_v33 }
  0x73   : > { %v3605_v40 = vsel %vm433_vm1, %v473_v52, %v474_v49  ;;  %v3628_v49 = vld [vmem:[%s3121_s7 + $0xf8] sm:$0xff] }
  0x74   : > { %4802 = vst [vmem:[#allocation30_spill] sm:$0xff] %v3582_v10 }
  0x75   : > { %2456 = vrot.lane.b32.xlu2 %v3494_v60, %s3026_s13  ;;  %4803 = vst [vmem:[#allocation31_spill] sm:$0xff] %v3586_v9  ;;  %v476_v60 = vrot.slane %v3263_v38, 7 }
  0x76   : > { %2446 = vrot.lane.b32.xlu0 %v3498_v45, %s3026_s13  ;;  %2451 = vrot.lane.b32.xlu1 %v3502_v46, %s3026_s13 }
  0x77   : > { %v3522_v12 = vpop.permute.xlu2 %2296 }
  0x7d   : > { %2471 = vrot.lane.b32.xlu2 %v3538_v62, %s3026_s13  ;;  %v477_v62 = vrot.slane %v3270_v39, 7 }
  0x7e   : > { %2461 = vrot.lane.b32.xlu0 %v3542_v63, %s3026_s13  ;;  %2466 = vrot.lane.b32.xlu1 %v3546_v56, %s3026_s13  ;;  %v3578_v63 = vsel %vm433_vm1, 0.0, %v461_v61  ;;  %v467_v61 = vrot.slane %v3227_v29, 7  ;;  %v3608_v29 = vsel %vm433_vm1, 0.0, %v473_v52  ;;  %v480_v56 = vrot.slane %v3312_v54, 7 }
  0x7f   : > { %v3566_v21 = vpop.permute.xlu2 %2301  ;;  %v3590_v59 = vpack.i.bf16 %v3575_v34, %v3578_v63  ;;  %v3632_v52 = vpack.i.bf16 %v3605_v40, %v3608_v29  ;;  %v3659_v39 = vsel %vm433_vm1, %v476_v60, %v477_v62 }
  0x80   : > { %v3613_v41 = vsel %vm433_vm1, %v467_v61, %v468_v51  ;;  %v3616_v42 = vsel %vm433_vm1, 0.0, %v467_v61  ;;  %4810 = vst [vmem:[#allocation38_spill] sm:$0xff] %v3659_v39 }
  0x81   : > { %4804 = vst [vmem:[#allocation32_spill] sm:$0xff] %v3590_v59  ;;  %v3636_v51 = vpack.i.bf16 %v3613_v41, %v3616_v42 }
  0x82   : > { %4807 = vst [vmem:[#allocation35_spill] sm:$0xff] %v3632_v52 }
  0x83   : > { %4808 = vst [vmem:[#allocation36_spill] sm:$0xff] %v3636_v51 }
  0x85   : > { %2486 = vrot.lane.b32.xlu2 %v3582_v10, %s3026_s13  ;;  %v479_v10 = vrot.slane %v3309_v53, 7  ;;  %v3662_v53 = vsel %vm433_vm1, 0.0, %v476_v60 }
  0x86   : > { %2476 = vrot.lane.b32.xlu0 %v3586_v9, %s3026_s13  ;;  %2481 = vrot.lane.b32.xlu1 %v3590_v59, %s3026_s13  ;;  %v3622_v9 = vsel %vm433_vm1, 0.0, %v470_v19  ;;  %v3625_v59 = vld [vmem:[%s3121_s7 + $0xf0] sm:$0xff]  ;;  %v483_v19 = vrot.slane %v3628_v49, 7  ;;  %4811 = vst [vmem:[#allocation39_spill] sm:$0xff] %v3662_v53 }
  0x87   : > { %v3610_v30 = vpop.permute.xlu2 %2321  ;;  %4806 = vst [vmem:[#allocation34_spill] sm:$0xff] %v3622_v9  ;;  %v3640_v61 = vpack.i.bf16 %v3619_v43, %v3622_v9  ;;  %v482_v57 = vrot.slane %v3625_v59, 7  ;;  %v3665_v54 = vsel %vm433_vm1, %v479_v10, %v480_v56 }
  0x88   : > { %4812 = vst [vmem:[#allocation40_spill] sm:$0xff] %v3665_v54 }
  0x89   : > { %4809 = vst [vmem:[#allocation37_spill] sm:$0xff] %v3640_v61  ;;  %v484_v9 = vsel %vm433_vm1, %v482_v57, %v483_v19  ;;  %v538_v43 = vsel %vm433_vm1, 0.0, %v482_v57  ;;  %v3676_v57 = vpack.i.bf16 %v3659_v39, %v3662_v53 }
  0x8a   : > { %v3672_v19 = vpack.i.bf16 %v484_v9, %v538_v43 }
  0x8b   : > { %4815 = vst [vmem:[#allocation43_spill] sm:$0xff] %v3676_v57 }
  0x8c   : > { %4814 = vst [vmem:[#allocation42_spill] sm:$0xff] %v3672_v19 }
  0x8d   : > { %2501 = vrot.lane.b32.xlu2 %v3632_v52, %s3026_s13  ;;  %v3668_v52 = vsel %vm433_vm1, 0.0, %v479_v10 }
  0x8e   : > { %2491 = vrot.lane.b32.xlu0 %v3636_v51, %s3026_s13  ;;  %2496 = vrot.lane.b32.xlu1 %v3640_v61, %s3026_s13  ;;  %4813 = vst [vmem:[#allocation41_spill] sm:$0xff] %v3668_v52  ;;  %v3680_v62 = vpack.i.bf16 %v3665_v54, %v3668_v52 }
  0x8f   : > { %v3656_v38 = vpop.permute.xlu2 %2336 }
  0x90   : > { %v3670_v51 = vpop.permute.xlu1 %2286  ;;  %v2282_v61 = vpop.permute.xlu0 %2281  ;;  %4816 = vst [vmem:[#allocation44_spill] sm:$0xff] %v3680_v62 }
  0x91   : > { %v2284_v9 = vunpack.i.h.bf16 %v2282_v61  ;;  %v2283_v43 = vunpack.i.l.bf16 %v2282_v61 }
  0x93   : > { %v1437_v61 = vsel %vm1434_vm2, %v3451_v6, %v2283_v43  ;;  %v1438_v53 = vsel %vm1434_vm2, %v3448_v5, %v2284_v9 }
  0x95   : > { %2516 = vrot.lane.b32.xlu2 %v3672_v19, %s3026_s13 }
  0x96   : > { %2506 = vrot.lane.b32.xlu0 %v3676_v57, %s3026_s13  ;;  %2511 = vrot.lane.b32.xlu1 %v3680_v62, %s3026_s13  ;;  %s348_s13 = scalar_lea.vmem %s4721_s2, %s2203_s11 }
  0x97   : > { %v3688_v60 = vpop.permute.xlu2 %2351 }
  0x98   : > { %4817 = vst [vmem:[#allocation45_spill] sm:$0xff] %v3688_v60  ;;  %v3690_v56 = vpop.permute.xlu1 %2291  ;;  %v3692_v10 = vpop.permute.xlu0 %2306  ;;  %v2298_v60 = vunpack.i.l.bf16 %v3522_v12 }
  0x9d   : > { %2531 = vrot.lane.b32.xlu2 %v3185_v18, %s3027_s14  ;;  %v2299_v18 = vunpack.i.h.bf16 %v3522_v12 }
  0x9e   : > { %2521 = vrot.lane.b32.xlu0 %v3155_v8, %s3027_s14  ;;  %2526 = vrot.lane.b32.xlu1 %v3151_v7, %s3027_s14 }
  0x9f   : > { %v2367_v19 = vpop.permute.xlu2 %2366  ;;  %v1444_v12 = vsel %vm1434_vm2, %v3475_v0, %v2299_v18  ;;  %v434_v18 = vrot.slane %v3169_v13, 7  ;;  %v2308_v13 = vunpack.i.l.bf16 %v3692_v10 }
  0xa0   : > { %v2317_v62 = vpop.permute.xlu1 %2316  ;;  %v2369_v57 = vunpack.i.h.bf16 %v2367_v19  ;;  %v2368_v52 = vunpack.i.l.bf16 %v2367_v19  ;;  %v3700_v54 = vpop.permute.xlu0 %2311 }
  0xa1   : > { %v2319_v43 = vunpack.i.h.bf16 %v2317_v62 }
  0xa2   : > { %v3707_v39 = vsel %vm1467_vm3, %v1437_v61, %v2368_v52  ;;  %v3710_v8 = vsel %vm1467_vm3, %v1438_v53, %v2369_v57  ;;  %v1443_v53 = vsel %vm1434_vm2, %v3478_v1, %v2298_v60 }
  0xa5   : > { %2546 = vrot.lane.b32.xlu2 %v3222_v28, %s3027_s14 }
  0xa6   : > { %2536 = vrot.lane.b32.xlu0 %v3138_v3, %s3027_s14  ;;  %2541 = vrot.lane.b32.xlu1 %v3181_v17, %s3027_s14  ;;  %v2318_v17 = vunpack.i.l.bf16 %v2317_v62  ;;  %v1450_v62 = vsel %vm1434_vm2, %v3517_v22, %v2319_v43  ;;  %v2289_v22 = vunpack.i.h.bf16 %v3670_v51 }
  0xa7   : > { %v2382_v5 = vpop.permute.xlu2 %2381 }
  0xa8   : > { %v2332_v6 = vpop.permute.xlu1 %2331  ;;  %v2384_v52 = vunpack.i.h.bf16 %v2382_v5  ;;  %v2383_v19 = vunpack.i.l.bf16 %v2382_v5  ;;  %v3720_v9 = vpop.permute.xlu0 %2326 }
  0xaa   : > { %v3727_v57 = vsel %vm1467_vm3, %v1444_v12, %v2384_v52  ;;  %v3730_v3 = vsel %vm1467_vm3, %v1443_v53, %v2383_v19  ;;  %v435_v52 = vrot.slane %v3171_v14, 7  ;;  %v2309_v19 = vunpack.i.h.bf16 %v3692_v10 }
  0xab   : > { %v522_v53 = vsel %vm433_vm1, 0.0, %v434_v18  ;;  %v2334_v12 = vunpack.i.h.bf16 %v2332_v6  ;;  %v2294_v10 = vunpack.i.h.bf16 %v3690_v56 }
  0xac   : > { %v436_v14 = vsel %vm433_vm1, %v434_v18, %v435_v52  ;;  %v1435_v43 = vsel %vm1434_vm2, %v522_v53, %v2308_v13 }
  0xad   : > { %2561 = vrot.lane.b32.xlu2 %v3258_v37, %s3027_s14  ;;  %v1449_v37 = vsel %vm1434_vm2, %v3520_v11, %v2318_v17  ;;  %v2288_v11 = vunpack.i.l.bf16 %v3670_v51  ;;  %v1456_v52 = vsel %vm1434_vm2, %v3561_v31, %v2334_v12  ;;  %v2304_v31 = vunpack.i.h.bf16 %v3566_v21 }
  0xae   : > { %2551 = vrot.lane.b32.xlu0 %v3218_v27, %s3027_s14  ;;  %2556 = vrot.lane.b32.xlu1 %v3214_v26, %s3027_s14 }
  0xaf   : > { %v2397_v1 = vpop.permute.xlu2 %2396  ;;  %v1439_v12 = vsel %vm1434_vm2, %v3484_v4, %v2288_v11 }
  0xb0   : > { %v2347_v0 = vpop.permute.xlu1 %2346  ;;  %v2399_v60 = vunpack.i.h.bf16 %v2397_v1  ;;  %v2398_v61 = vunpack.i.l.bf16 %v2397_v1  ;;  %v3739_v5 = vpop.permute.xlu0 %2341  ;;  %v2333_v1 = vunpack.i.l.bf16 %v2332_v6  ;;  %v1436_v6 = vsel %vm1434_vm2, %v436_v14, %v2309_v19 }
  0xb1   : > { %v2293_v19 = vunpack.i.l.bf16 %v3690_v56  ;;  %v1442_v56 = vsel %vm1434_vm2, %v3487_v15, %v2294_v10 }
  0xb2   : > { %v3747_v27 = vsel %vm1467_vm3, %v1450_v62, %v2399_v60  ;;  %v3750_v26 = vsel %vm1467_vm3, %v1449_v37, %v2398_v61 }
  0xb3   : > { %4818 = vst [vmem:[#allocation46_spill] sm:$0xff] %v3750_v26  ;;  %v2348_v26 = vunpack.i.l.bf16 %v2347_v0 }
  0xb5   : > { %2576 = vrot.lane.b32.xlu2 %v3296_v48, %s3027_s14  ;;  %v1461_v15 = vsel %vm1434_vm2, %v3608_v29, %v2348_v26 }
  0xb6   : > { %2566 = vrot.lane.b32.xlu0 %v3254_v36, %s3027_s14  ;;  %2571 = vrot.lane.b32.xlu1 %v3250_v35, %s3027_s14  ;;  %v1455_v35 = vsel %vm1434_vm2, %v3564_v20, %v2333_v1  ;;  %v2303_v20 = vunpack.i.l.bf16 %v3566_v21  ;;  %v1440_v1 = vsel %vm1434_vm2, %v3481_v2, %v2289_v22  ;;  %v2314_v21 = vunpack.i.h.bf16 %v3700_v54 }
  0xb7   : > { %v2412_v17 = vpop.permute.xlu2 %2411 }
  0xb8   : > { %v2414_v18 = vunpack.i.h.bf16 %v2412_v17  ;;  %v2413_v60 = vunpack.i.l.bf16 %v2412_v17  ;;  %v3767_v48 = vpop.permute.xlu0 %2356  ;;  %v2362_v61 = vpop.permute.xlu1 %2361  ;;  %v2349_v17 = vunpack.i.h.bf16 %v2347_v0  ;;  %v2313_v0 = vunpack.i.l.bf16 %v3700_v54 }
  0xb9   : > { %v2364_v62 = vunpack.i.h.bf16 %v2362_v61  ;;  %v2363_v51 = vunpack.i.l.bf16 %v2362_v61 }
  0xba   : > { %v3774_v37 = vsel %vm1467_vm3, %v1456_v52, %v2414_v18  ;;  %v3777_v13 = vsel %vm1467_vm3, %v1455_v35, %v2413_v60  ;;  %v1462_v2 = vsel %vm1434_vm2, %v3605_v40, %v2349_v17  ;;  %v2595_v40 = vpack.i.bf16 %v3628_v49, %v3625_v59 }
  0xbb   : > { %v1468_v53 = vsel %vm1467_vm3, %v1435_v43, %v2363_v51  ;;  %v1469_v14 = vsel %vm1467_vm3, %v1436_v6, %v2364_v62  ;;  %v1446_v52 = vsel %vm1434_vm2, %v3525_v23, %v2304_v31  ;;  %v1445_v59 = vsel %vm1434_vm2, %v3528_v24, %v2303_v20  ;;  %v4819_v62 = vld [vmem:[#allocation6_spill] sm:$0xff] }
  0xbc   : > { %v2324_v49 = vunpack.i.h.bf16 %v3610_v30  ;;  %v2323_v35 = vunpack.i.l.bf16 %v3610_v30  ;;  %v1448_v51 = vsel %vm1434_vm2, %v3531_v25, %v2314_v21  ;;  %v2329_v23 = vunpack.i.h.bf16 %v3720_v9  ;;  %v4821_v21 = vld [vmem:[#allocation11_spill] sm:$0xff] }
  0xbd   : > { %2591 = vrot.lane.b32.xlu2 %v3320_v58, %s3027_s14  ;;  %v1441_v58 = vsel %vm1434_vm2, %v3490_v16, %v2293_v19  ;;  %v1447_v19 = vsel %vm1434_vm2, %v3534_v50, %v2313_v0  ;;  %v2328_v24 = vunpack.i.l.bf16 %v3720_v9  ;;  %v4820_v50 = vld [vmem:[#allocation7_spill] sm:$0xff] }
  0xbe   : > { %2581 = vrot.lane.b32.xlu0 %v3292_v47, %s3027_s14  ;;  %2586 = vrot.lane.b32.xlu1 %v3286_v44, %s3027_s14  ;;  %v2610_v0 = vpack.i.bf16 %v4821_v21, %v4820_v50 }
  0xbf   : > { %v2427_v4 = vpop.permute.xlu2 %2426 }
  0xc0   : > { %v2429_v22 = vunpack.i.h.bf16 %v2427_v4  ;;  %v2428_v11 = vunpack.i.l.bf16 %v2427_v4  ;;  %v2372_v47 = vpop.permute.xlu0 %2371  ;;  %v2377_v10 = vpop.permute.xlu1 %2376 }
  0xc1   : > { %v2374_v43 = vunpack.i.h.bf16 %v2372_v47  ;;  %v2373_v44 = vunpack.i.l.bf16 %v2372_v47  ;;  %v2379_v6 = vunpack.i.h.bf16 %v2377_v10  ;;  %v2378_v18 = vunpack.i.l.bf16 %v2377_v10 }
  0xc2   : > { %v3805_v16 = vsel %vm1467_vm3, %v1462_v2, %v2429_v22  ;;  %v3808_v54 = vsel %vm1467_vm3, %v1461_v15, %v2428_v11  ;;  %v2339_v47 = vunpack.i.h.bf16 %v3656_v38  ;;  %v2338_v10 = vunpack.i.l.bf16 %v3656_v38 }
  0xc3   : > { %v3813_v60 = vsel %vm1467_vm3, %v1440_v1, %v2374_v43  ;;  %v3816_v29 = vsel %vm1467_vm3, %v1439_v12, %v2373_v44  ;;  %v1475_v26 = vsel %vm1467_vm3, %v1442_v56, %v2379_v6  ;;  %v1474_v61 = vsel %vm1467_vm3, %v1441_v58, %v2378_v18 }
  0xc4   : > { %v1454_v43 = vsel %vm1434_vm2, %v3575_v34, %v2329_v23 }
  0xc5   : > { %2606 = vrot.lane.b32.xlu2 %v3345_v55, %s3028_s21 }
  0xc6   : > { %2596 = vrot.lane.b32.xlu0 %v2595_v40, %s3027_s14  ;;  %2601 = vrot.lane.b32.xlu1 %v4819_v62, %s3028_s21  ;;  %v4823_v62 = vld [vmem:[#allocation16_spill] sm:$0xff] }
  0xc7   : > { %v2442_v17 = vpop.permute.xlu2 %2441 }
  0xc8   : > { %v2444_v31 = vunpack.i.h.bf16 %v2442_v17  ;;  %v2443_v20 = vunpack.i.l.bf16 %v2442_v17  ;;  %v2387_v30 = vpop.permute.xlu0 %2386  ;;  %v2392_v12 = vpop.permute.xlu1 %2391 }
  0xc9   : > { %v2389_v1 = vunpack.i.h.bf16 %v2387_v30  ;;  %v2388_v56 = vunpack.i.l.bf16 %v2387_v30  ;;  %v2394_v58 = vunpack.i.h.bf16 %v2392_v12  ;;  %v2393_v4 = vunpack.i.l.bf16 %v2392_v12  ;;  %v4825_v30 = vld [vmem:[#allocation33_spill] sm:$0xff] }
  0xca   : > { %v3838_v2 = vsel %vm1500_vm4, %v1468_v53, %v2443_v20  ;;  %v3841_v25 = vsel %vm1500_vm4, %v1469_v14, %v2444_v31  ;;  %v1452_v53 = vsel %vm1434_vm2, %v3569_v32, %v2324_v49  ;;  %v1451_v14 = vsel %vm1434_vm2, %v3572_v33, %v2323_v35 }
  0xcb   : > { %v3846_v15 = vsel %vm1467_vm3, %v1446_v52, %v2389_v1  ;;  %v3849_v9 = vsel %vm1467_vm3, %v1445_v59, %v2388_v56  ;;  %v1481_v22 = vsel %vm1467_vm3, %v1448_v51, %v2394_v58  ;;  %v1480_v11 = vsel %vm1467_vm3, %v1447_v19, %v2393_v4 }
  0xcc   : > { %v2344_v32 = vunpack.i.h.bf16 %v3739_v5  ;;  %v2343_v33 = vunpack.i.l.bf16 %v3739_v5  ;;  %v2359_v56 = vunpack.i.h.bf16 %v3767_v48 }
  0xcd   : > { %2621 = vrot.lane.b32.xlu2 %v3151_v7, %s3029_s22  ;;  %v1453_v7 = vsel %vm1434_vm2, %v3578_v63, %v2328_v24  ;;  %v4822_v63 = vld [vmem:[#allocation12_spill] sm:$0xff]  ;;  %v4824_v24 = vld [vmem:[#allocation45_spill] sm:$0xff] }
  0xce   : > { %2611 = vrot.lane.b32.xlu0 %v2610_v0, %s3028_s21  ;;  %2616 = vrot.lane.b32.xlu1 %v3498_v45, %s3030_s24  ;;  %v2630_v51 = vpack.i.bf16 %v4823_v62, %v4822_v63  ;;  %v2354_v31 = vunpack.i.h.bf16 %v4824_v24  ;;  %v2353_v20 = vunpack.i.l.bf16 %v4824_v24  ;;  %v1460_v12 = vsel %vm1434_vm2, %v4825_v30, %v2344_v32 }
  0xcf   : > { %v2457_v44 = vpop.permute.xlu2 %2456 }
  0xd0   : > { %v2459_v6 = vunpack.i.h.bf16 %v2457_v44  ;;  %v2458_v18 = vunpack.i.l.bf16 %v2457_v44  ;;  %v2402_v40 = vpop.permute.xlu0 %2401  ;;  %v2407_v52 = vpop.permute.xlu1 %2406  ;;  %v2358_v44 = vunpack.i.l.bf16 %v3767_v48  ;;  %v4832_v48 = vld [vmem:[#allocation41_spill] sm:$0xff] }
  0xd1   : > { %v2404_v59 = vunpack.i.h.bf16 %v2402_v40  ;;  %v2403_v49 = vunpack.i.l.bf16 %v2402_v40  ;;  %v2409_v45 = vunpack.i.h.bf16 %v2407_v52  ;;  %v2408_v35 = vunpack.i.l.bf16 %v2407_v52  ;;  %v4831_v52 = vld [vmem:[#allocation40_spill] sm:$0xff] }
  0xd2   : > { %v3871_v38 = vsel %vm1500_vm4, %v1474_v61, %v2458_v18  ;;  %v3874_v34 = vsel %vm1500_vm4, %v1475_v26, %v2459_v6  ;;  %v1458_v26 = vsel %vm1434_vm2, %v3613_v41, %v2339_v47  ;;  %v1457_v61 = vsel %vm1434_vm2, %v3616_v42, %v2338_v10  ;;  %v4830_v18 = vld [vmem:[#allocation39_spill] sm:$0xff] }
  0xd3   : > { %v3879_v19 = vsel %vm1467_vm3, %v1452_v53, %v2404_v59  ;;  %v3882_v5 = vsel %vm1467_vm3, %v1451_v14, %v2403_v49  ;;  %v1487_v23 = vsel %vm1467_vm3, %v1454_v43, %v2409_v45  ;;  %v1486_v17 = vsel %vm1467_vm3, %v1453_v7, %v2408_v35 }
  0xd4   : > { %v1463_v40 = vsel %vm1434_vm2, %v4830_v18, %v2353_v20  ;;  %v1466_v59 = vsel %vm1434_vm2, %v4831_v52, %v2359_v56  ;;  %v1465_v45 = vsel %vm1434_vm2, %v4832_v48, %v2358_v44 }
  0xd5   : > { %2636 = vrot.lane.b32.xlu2 %v3502_v46, %s3030_s24  ;;  %v4826_v46 = vld [vmem:[#allocation34_spill] sm:$0xff] }
  0xd6   : > { %2626 = vrot.lane.b32.xlu0 %v3345_v55, %s3031_s26  ;;  %2631 = vrot.lane.b32.xlu1 %v2630_v51, %s3028_s21  ;;  %v1459_v1 = vsel %vm1434_vm2, %v4826_v46, %v2343_v33  ;;  %v4829_v33 = vld [vmem:[#allocation38_spill] sm:$0xff]  ;;  %v4833_v51 = vld [vmem:[#allocation17_spill] sm:$0xff] }
  0xd7   : > { %v2472_v41 = vpop.permute.xlu2 %2471  ;;  %v1464_v6 = vsel %vm1434_vm2, %v4829_v33, %v2354_v31 }
  0xd8   : > { %v2474_v42 = vunpack.i.h.bf16 %v2472_v41  ;;  %v2473_v58 = vunpack.i.l.bf16 %v2472_v41  ;;  %v2417_v4 = vpop.permute.xlu0 %2416  ;;  %v2422_v50 = vpop.permute.xlu1 %2421 }
  0xd9   : > { %v2419_v55 = vunpack.i.h.bf16 %v2417_v4  ;;  %v2418_v21 = vunpack.i.l.bf16 %v2417_v4  ;;  %v2424_v0 = vunpack.i.h.bf16 %v2422_v50  ;;  %v2423_v53 = vunpack.i.l.bf16 %v2422_v50 }
  0xda   : > { %v3903_v14 = vsel %vm1500_vm4, %v1480_v11, %v2473_v58  ;;  %v3906_v47 = vsel %vm1500_vm4, %v1481_v22, %v2474_v42  ;;  %v4827_v11 = vld [vmem:[#allocation29_spill] sm:$0xff]  ;;  %v4835_v58 = vld [vmem:[#allocation10_spill] sm:$0xff] }
  0xdb   : > { %v3909_v10 = vsel %vm1467_vm3, %v1458_v26, %v2419_v55  ;;  %v3912_v43 = vsel %vm1467_vm3, %v1457_v61, %v2418_v21  ;;  %v1493_v7 = vsel %vm1467_vm3, %v1460_v12, %v2424_v0  ;;  %v1492_v32 = vsel %vm1467_vm3, %v1459_v1, %v2423_v53  ;;  %v4828_v22 = vld [vmem:[#allocation5_spill] sm:$0xff]  ;;  %v4834_v26 = vld [vmem:[#allocation8_spill] sm:$0xff] }
  0xdc   : > { %v2665_v61 = vpack.i.bf16 %v4834_v26, %v4833_v51 }
  0xdd   : > { %2651 = vrot.lane.b32.xlu2 %v3222_v28, %s3029_s22 }
  0xde   : > { %2641 = vrot.lane.b32.xlu0 %v4827_v11, %s3030_s24  ;;  %2646 = vrot.lane.b32.xlu1 %v4828_v22, %s3029_s22 }
  0xdf   : > { %v2487_v49 = vpop.permute.xlu2 %2486 }
  0xe0   : > { %v2489_v28 = vunpack.i.h.bf16 %v2487_v49  ;;  %v2488_v35 = vunpack.i.l.bf16 %v2487_v49  ;;  %v2432_v63 = vpop.permute.xlu0 %2431  ;;  %v2437_v62 = vpop.permute.xlu1 %2436 }
  0xe1   : > { %v2434_v24 = vunpack.i.h.bf16 %v2432_v63  ;;  %v2433_v30 = vunpack.i.l.bf16 %v2432_v63  ;;  %v2439_v31 = vunpack.i.h.bf16 %v2437_v62  ;;  %v2438_v12 = vunpack.i.l.bf16 %v2437_v62 }
  0xe2   : > { %v3934_v20 = vsel %vm1500_vm4, %v1486_v17, %v2488_v35  ;;  %v3937_v46 = vsel %vm1500_vm4, %v1487_v23, %v2489_v28  ;;  %v4836_v17 = vld [vmem:[#allocation15_spill] sm:$0xff] }
  0xe3   : > { %v3940_v1 = vsel %vm1467_vm3, %v1464_v6, %v2434_v24  ;;  %v3943_v41 = vsel %vm1467_vm3, %v1463_v40, %v2433_v30  ;;  %v1499_v56 = vsel %vm1467_vm3, %v1466_v59, %v2439_v31  ;;  %v1498_v42 = vsel %vm1467_vm3, %v1465_v45, %v2438_v12 }
  0xe5   : > { %2666 = vrot.lane.b32.xlu2 %v2665_v61, %s3028_s21  ;;  %v4839_v61 = vld [vmem:[#allocation27_spill] sm:$0xff] }
  0xe6   : > { %2656 = vrot.lane.b32.xlu0 %v4835_v58, %s3031_s26  ;;  %2661 = vrot.lane.b32.xlu1 %v4836_v17, %s3031_s26 }
  0xe7   : > { %v2502_v23 = vpop.permute.xlu2 %2501 }
  0xe8   : > { %v2504_v4 = vunpack.i.h.bf16 %v2502_v23  ;;  %v2503_v50 = vunpack.i.l.bf16 %v2502_v23  ;;  %v2447_v55 = vpop.permute.xlu0 %2446  ;;  %v2452_v21 = vpop.permute.xlu1 %2451  ;;  %v2922_v23 = vld [vmem:[%s3121_s7 + $0x30] sm:$0xff] }
  0xe9   : > { %v2449_v0 = vunpack.i.h.bf16 %v2447_v55  ;;  %v2448_v53 = vunpack.i.l.bf16 %v2447_v55  ;;  %v2454_v44 = vunpack.i.h.bf16 %v2452_v21  ;;  %v2453_v11 = vunpack.i.l.bf16 %v2452_v21  ;;  %v2924_v55 = vld [vmem:[%s3121_s7 + $0x60] sm:$0xff]  ;;  %v2925_v21 = vld [vmem:[%s3121_s7 + $0x68] sm:$0xff] }
  0xea   : > { %v3953_v22 = vsel %vm1500_vm4, %v1492_v32, %v2503_v50  ;;  %v3956_v33 = vsel %vm1500_vm4, %v1493_v7, %v2504_v4  ;;  %v4837_v32 = vld [vmem:[#allocation18_spill] sm:$0xff]  ;;  %v2923_v4 = vld [vmem:[%s3121_s7 + $0x38] sm:$0xff] }
  0xeb   : > { %v3960_v6 = vsel %vm1500_vm4, %v3710_v8, %v2449_v0  ;;  %v3964_v18 = vsel %vm1500_vm4, %v3707_v39, %v2448_v53  ;;  %v1506_v40 = vsel %vm1500_vm4, %v3813_v60, %v2454_v44  ;;  %v1505_v52 = vsel %vm1500_vm4, %v3816_v29, %v2453_v11  ;;  %v4838_v7 = vld [vmem:[#allocation30_spill] sm:$0xff] }
  0xec   : > { %v2700_v50 = vpack.i.bf16 %v2923_v4, %v2922_v23  ;;  %v2705_v0 = vpack.i.bf16 %v2925_v21, %v2924_v55  ;;  %v4841_v44 = vld [vmem:[#allocation46_spill] sm:$0xff]  ;;  %v4845_v4 = vld [vmem:[#allocation36_spill] sm:$0xff] }
  0xed   : > { %2681 = vrot.lane.b32.xlu2 %v4837_v32, %s3031_s26 }
  0xee   : > { %2671 = vrot.lane.b32.xlu0 %v4838_v7, %s3030_s24  ;;  %2676 = vrot.lane.b32.xlu1 %v3254_v36, %s3029_s22  ;;  %v4842_v7 = vld [vmem:[#allocation9_spill] sm:$0xff] }
  0xef   : > { %v2517_v8 = vpop.permute.xlu2 %2516 }
  0xf0   : > { %v2519_v59 = vunpack.i.h.bf16 %v2517_v8  ;;  %v2518_v49 = vunpack.i.l.bf16 %v2517_v8  ;;  %v2462_v39 = vpop.permute.xlu0 %2461  ;;  %v2467_v48 = vpop.permute.xlu1 %2466 }
  0xf1   : > { %v2464_v45 = vunpack.i.h.bf16 %v2462_v39  ;;  %v2463_v28 = vunpack.i.l.bf16 %v2462_v39  ;;  %v2469_v60 = vunpack.i.h.bf16 %v2467_v48  ;;  %v2468_v35 = vunpack.i.l.bf16 %v2467_v48 }
  0xf2   : > { %v3977_v29 = vsel %vm1500_vm4, %v1498_v42, %v2518_v49  ;;  %v3980_v63 = vsel %vm1500_vm4, %v1499_v56, %v2519_v59 }
  0xf3   : > { %v3984_v62 = vsel %vm1500_vm4, %v3727_v57, %v2464_v45  ;;  %v3988_v36 = vsel %vm1500_vm4, %v3730_v3, %v2463_v28  ;;  %v1512_v51 = vsel %vm1500_vm4, %v3846_v15, %v2469_v60  ;;  %v1511_v26 = vsel %vm1500_vm4, %v3849_v9, %v2468_v35  ;;  %v4840_v57 = vld [vmem:[#allocation26_spill] sm:$0xff] }
  0xf5   : > { %2696 = vrot.lane.b32.xlu2 %v4839_v61, %s3030_s24 }
  0xf6   : > { %2686 = vrot.lane.b32.xlu0 %v4836_v17, %s3028_s21  ;;  %2691 = vrot.lane.b32.xlu1 %v4840_v57, %s3030_s24 }
  0xf7   : > { %v2532_v3 = vpop.permute.xlu2 %2531 }
  0xf8   : > { %v2534_v24 = vunpack.i.h.bf16 %v2532_v3  ;;  %v2533_v15 = vunpack.i.l.bf16 %v2532_v3  ;;  %v2477_v30 = vpop.permute.xlu0 %2476  ;;  %v2482_v31 = vpop.permute.xlu1 %2481 }
  0xf9   : > { %v2479_v9 = vunpack.i.h.bf16 %v2477_v30  ;;  %v2478_v12 = vunpack.i.l.bf16 %v2477_v30  ;;  %v2484_v56 = vunpack.i.h.bf16 %v2482_v31  ;;  %v2483_v42 = vunpack.i.l.bf16 %v2482_v31  ;;  %v2927_v30 = vld [vmem:[%s3121_s7 + $0xa8] sm:$0xff] }
  0xfa   : > { %v4001_v58 = vsel %vm1533_vm5, %v1505_v52, %v2533_v15  ;;  %v4004_v17 = vsel %vm1533_vm5, %v1506_v40, %v2534_v24  ;;  %v2926_v15 = vld [vmem:[%s3121_s7 + $0xa0] sm:$0xff] }
  0xfb   : > { %v4012_v53 = vsel %vm1500_vm4, %v3747_v27, %v2479_v9  ;;  %v4016_v11 = vsel %vm1500_vm4, %v4841_v44, %v2478_v12  ;;  %v4020_v52 = vsel %vm1500_vm4, %v3879_v19, %v2484_v56  ;;  %v4024_v40 = vsel %vm1500_vm4, %v3882_v5, %v2483_v42 }
  0xfc   : > { %v2740_v31 = vpack.i.bf16 %v2927_v30, %v2926_v15 }
  0xfd   : > { %2711 = vrot.lane.b32.xlu2 %v4842_v7, %s3031_s26 }
  0xfe   : > { %2701 = vrot.lane.b32.xlu0 %v2700_v50, %s3029_s22  ;;  %2706 = vrot.lane.b32.xlu1 %v2705_v0, %s3029_s22 }
  0xff   : > { %v2547_v27 = vpop.permute.xlu2 %2546 }
 0x100   : > { %v2549_v8 = vunpack.i.h.bf16 %v2547_v27  ;;  %v2548_v59 = vunpack.i.l.bf16 %v2547_v27  ;;  %v2492_v49 = vpop.permute.xlu0 %2491  ;;  %v2497_v39 = vpop.permute.xlu1 %2496 }
 0x101   : > { %v2494_v48 = vunpack.i.h.bf16 %v2492_v49  ;;  %v2493_v19 = vunpack.i.l.bf16 %v2492_v49  ;;  %v2499_v45 = vunpack.i.h.bf16 %v2497_v39  ;;  %v2498_v28 = vunpack.i.l.bf16 %v2497_v39 }
 0x102   : > { %v4031_v5 = vsel %vm1533_vm5, %v1511_v26, %v2548_v59  ;;  %v4034_v60 = vsel %vm1533_vm5, %v1512_v51, %v2549_v8  ;;  %v4843_v26 = vld [vmem:[#allocation21_spill] sm:$0xff]  ;;  %v2928_v8 = vld [vmem:[%s3121_s7 + $0xd0] sm:$0xff]  ;;  %v2929_v59 = vld [vmem:[%s3121_s7 + $0xd8] sm:$0xff] }
 0x103   : > { %v4038_v35 = vsel %vm1500_vm4, %v3774_v37, %v2494_v48  ;;  %v4042_v61 = vsel %vm1500_vm4, %v3777_v13, %v2493_v19  ;;  %v1524_v57 = vsel %vm1500_vm4, %v3909_v10, %v2499_v45  ;;  %v1523_v3 = vsel %vm1500_vm4, %v3912_v43, %v2498_v28  ;;  %v4844_v51 = vld [vmem:[#allocation13_spill] sm:$0xff]  ;;  %v4847_v19 = vld [vmem:[#allocation24_spill] sm:$0xff]  ;;  %v4848_v45 = vld [vmem:[#allocation22_spill] sm:$0xff] }
 0x104   : > { %v2745_v49 = vpack.i.bf16 %v2929_v59, %v2928_v8  ;;  %v2933_v8 = vld [vmem:[%s3121_s7 + $0x48] sm:$0xff] }
 0x105   : > { %2726 = vrot.lane.b32.xlu2 %v4843_v26, %s3028_s21 }
 0x106   : > { %2716 = vrot.lane.b32.xlu0 %v4844_v51, %s3031_s26  ;;  %2721 = vrot.lane.b32.xlu1 %v4837_v32, %s3028_s21 }
 0x107   : > { %v4054_v37 = vpop.permute.xlu2 %2561 }
 0x108   : > { %v2507_v24 = vpop.permute.xlu0 %2506  ;;  %v2512_v13 = vpop.permute.xlu1 %2511 }
 0x109   : > { %v2509_v10 = vunpack.i.h.bf16 %v2507_v24  ;;  %v2508_v9 = vunpack.i.l.bf16 %v2507_v24  ;;  %v2514_v12 = vunpack.i.h.bf16 %v2512_v13  ;;  %v2513_v43 = vunpack.i.l.bf16 %v2512_v13 }
 0x10b   : > { %v4060_v56 = vsel %vm1500_vm4, %v3805_v16, %v2509_v10  ;;  %v4064_v42 = vsel %vm1500_vm4, %v3808_v54, %v2508_v9  ;;  %v1530_v32 = vsel %vm1500_vm4, %v3940_v1, %v2514_v12  ;;  %v1529_v23 = vsel %vm1500_vm4, %v3943_v41, %v2513_v43  ;;  %v4846_v16 = vld [vmem:[#allocation43_spill] sm:$0xff]  ;;  %v4849_v9 = vld [vmem:[#allocation28_spill] sm:$0xff]  ;;  %v1718_v12 = vld [vmem:[%s4722_s3 + $0x10] sm:$0x3] }
 0x10d   : > { %2741 = vrot.lane.b32.xlu2 %v2740_v31, %s3029_s22 }
 0x10e   : > { %2731 = vrot.lane.b32.xlu0 %v4845_v4, %s3030_s24  ;;  %2736 = vrot.lane.b32.xlu1 %v4846_v16, %s3030_s24  ;;  %v2931_v4 = vld [vmem:[%s3121_s7 + $0x78] sm:$0xff] }
 0x10f   : > { %v2577_v50 = vpop.permute.xlu2 %2576 }
 0x110   : > { %v2579_v55 = vunpack.i.h.bf16 %v2577_v50  ;;  %v2578_v21 = vunpack.i.l.bf16 %v2577_v50  ;;  %v4075_v54 = vpop.permute.xlu0 %2521  ;;  %v2527_v0 = vpop.permute.xlu1 %2526 }
 0x111   : > { %v2529_v44 = vunpack.i.h.bf16 %v2527_v0  ;;  %v2528_v27 = vunpack.i.l.bf16 %v2527_v0 }
 0x112   : > { %v4078_v1 = vsel %vm1533_vm5, %v1523_v3, %v2578_v21  ;;  %v4081_v41 = vsel %vm1533_vm5, %v1524_v57, %v2579_v55 }
 0x113   : > { %v4087_v39 = vsel %vm1533_vm5, %v3960_v6, %v2529_v44  ;;  %v4091_v48 = vsel %vm1533_vm5, %v3964_v18, %v2528_v27  ;;  %v2932_v27 = vld [vmem:[%s3121_s7 + $0x40] sm:$0xff] }
 0x114   : > { %v2780_v59 = vpack.i.bf16 %v2933_v8, %v2932_v27  ;;  %v4853_v8 = vld [vmem:[#allocation44_spill] sm:$0xff] }
 0x115   : > { %2756 = vrot.lane.b32.xlu2 %v4847_v19, %s3031_s26 }
 0x116   : > { %2746 = vrot.lane.b32.xlu0 %v2745_v49, %s3029_s22  ;;  %2751 = vrot.lane.b32.xlu1 %v4848_v45, %s3031_s26 }
 0x117   : > { %v2592_v28 = vpop.permute.xlu2 %2591 }
 0x118   : > { %v2594_v57 = vunpack.i.h.bf16 %v2592_v28  ;;  %v2593_v3 = vunpack.i.l.bf16 %v2592_v28  ;;  %v2537_v24 = vpop.permute.xlu0 %2536  ;;  %v4098_v13 = vpop.permute.xlu1 %2541 }
 0x119   : > { %v2539_v6 = vunpack.i.h.bf16 %v2537_v24  ;;  %v2538_v15 = vunpack.i.l.bf16 %v2537_v24 }
 0x11a   : > { %v4101_v18 = vsel %vm1533_vm5, %v1529_v23, %v2593_v3  ;;  %v4104_v30 = vsel %vm1533_vm5, %v1530_v32, %v2594_v57  ;;  %v2930_v23 = vld [vmem:[%s3121_s7 + $0x70] sm:$0xff] }
 0x11b   : > { %v4108_v31 = vsel %vm1533_vm5, %v3871_v38, %v2538_v15  ;;  %v4112_v10 = vsel %vm1533_vm5, %v3874_v34, %v2539_v6  ;;  %v1728_v38 = vunpack.c.l.b16 %v1718_v12  ;;  %v2785_v16 = vpack.i.bf16 %v2931_v4, %v2930_v23  ;;  %v4850_v3 = vld [vmem:[#allocation31_spill] sm:$0xff]  ;;  %v2204_v12 = vld [vmem:[%s4722_s3] sm:$0xff] }
 0x11d   : > { %2771 = vrot.lane.b32.xlu2 %v4849_v9, %s3030_s24  ;;  %v1731_v50 = vpack.c.b16 %v1728_v38, %v1728_v38 }
 0x11e   : > { %2761 = vrot.lane.b32.xlu0 %v4842_v7, %s3028_s21  ;;  %2766 = vrot.lane.b32.xlu1 %v4844_v51, %s3028_s21 }
 0x11f   : > { %v4123_v43 = vpop.permute.xlu2 %2606  ;;  %v1785_v57 = vsel %vm1783_vm6, %v1731_v50, 0 }
 0x120   : > { %v2552_v34 = vpop.permute.xlu0 %2551  ;;  %v2557_v32 = vpop.permute.xlu1 %2556  ;;  %1792 = vmatpush.bf16.msra.mxu0 %v1785_v57  ;;  %2207 = vmatpush.bf16.msra.mxu1 %v1785_v57 }
 0x121   : > { %v2554_v55 = vunpack.i.h.bf16 %v2552_v34  ;;  %v2553_v21 = vunpack.i.l.bf16 %v2552_v34  ;;  %v2559_v0 = vunpack.i.h.bf16 %v2557_v32  ;;  %v2558_v44 = vunpack.i.l.bf16 %v2557_v32  ;;  %2208 = vmatpush.bf16.msra.mxu2 %v1785_v57  ;;  %2209 = vmatpush.bf16.msra.mxu3 %v1785_v57 }
 0x123   : > { %v4131_v7 = vsel %vm1533_vm5, %v3903_v14, %v2553_v21  ;;  %v4135_v51 = vsel %vm1533_vm5, %v3906_v47, %v2554_v55  ;;  %v4139_v49 = vsel %vm1533_vm5, %v4012_v53, %v2559_v0  ;;  %v4143_v28 = vsel %vm1533_vm5, %v4016_v11, %v2558_v44  ;;  %v2205_v14 = vld [vmem:[%s4722_s3 + $0x8] sm:$0xff] }
 0x124   : > { %1793 = vmatpush.bf16.msra.mxu0 %v2205_v14  ;;  %2210 = vmatpush.bf16.msra.mxu1 %v2205_v14 }
 0x125   : > { %2786 = vrot.lane.b32.xlu2 %v2785_v16, %s3029_s22  ;;  %2211 = vmatpush.bf16.msra.mxu2 %v2205_v14 }
 0x126   : > { %2776 = vrot.lane.b32.xlu0 %v4850_v3, %s3030_s24  ;;  %2781 = vrot.lane.b32.xlu1 %v2780_v59, %s3029_s22  ;;  %v2934_v3 = vld [vmem:[%s3121_s7 + $0xb0] sm:$0xff] }
 0x127   : > { %v4152_v47 = vpop.permute.xlu2 %2621  ;;  %2212 = vmatpush.bf16.msra.mxu3 %v2205_v14 }
 0x128   : > { %v2567_v53 = vpop.permute.xlu0 %2566  ;;  %v2572_v11 = vpop.permute.xlu1 %2571  ;;  %1794 = vmatpush.bf16.msra.mxu0 %v2204_v12  ;;  %2213 = vmatpush.bf16.msra.mxu1 %v2204_v12 }
 0x129   : > { %v2569_v24 = vunpack.i.h.bf16 %v2567_v53  ;;  %v2568_v6 = vunpack.i.l.bf16 %v2567_v53  ;;  %v2574_v15 = vunpack.i.h.bf16 %v2572_v11  ;;  %v2573_v9 = vunpack.i.l.bf16 %v2572_v11  ;;  %2214 = vmatpush.bf16.msra.mxu2 %v2204_v12  ;;  %v2935_v53 = vld [vmem:[%s3121_s7 + $0xb8] sm:$0xff] }
 0x12a   : > { %v2820_v11 = vpack.i.bf16 %v2935_v53, %v2934_v3 }
 0x12b   : > { %v4159_v38 = vsel %vm1533_vm5, %v3934_v20, %v2568_v6  ;;  %v4163_v34 = vsel %vm1533_vm5, %v3937_v46, %v2569_v24  ;;  %v4167_v32 = vsel %vm1533_vm5, %v4038_v35, %v2574_v15  ;;  %v4171_v23 = vsel %vm1533_vm5, %v4042_v61, %v2573_v9  ;;  %v4851_v20 = vld [vmem:[#allocation14_spill] sm:$0xff]  ;;  %v4852_v46 = vld [vmem:[#allocation19_spill] sm:$0xff]  ;;  %2215 = vmatpush.bf16.msra.mxu3 %v2204_v12 }
 0x12c   : > { %v2937_v24 = vld [vmem:[%s3121_s7 + $0xe8] sm:$0xff]  ;;  %v4855_v9 = vld [vmem:[#allocation23_spill] sm:$0xff] }
 0x12d   : > { %2801 = vrot.lane.b32.xlu2 %v4848_v45, %s3028_s21 }
 0x12e   : > { %2791 = vrot.lane.b32.xlu0 %v4851_v20, %s3031_s26  ;;  %2796 = vrot.lane.b32.xlu1 %v4852_v46, %s3031_s26 }
 0x12f   : > { %v4179_v4 = vpop.permute.xlu2 %2636 }
 0x130   : > { %v2582_v35 = vpop.permute.xlu0 %2581  ;;  %v2587_v16 = vpop.permute.xlu1 %2586 }
 0x131   : > { %v2584_v61 = vunpack.i.h.bf16 %v2582_v35  ;;  %v2583_v50 = vunpack.i.l.bf16 %v2582_v35  ;;  %v2589_v55 = vunpack.i.h.bf16 %v2587_v16  ;;  %v2588_v45 = vunpack.i.l.bf16 %v2587_v16 }
 0x132   : > { %v2524_v16 = vunpack.i.h.bf16 %v4075_v54 }
 0x133   : > { %v4183_v21 = vsel %vm1533_vm5, %v3953_v22, %v2583_v50  ;;  %v4187_v0 = vsel %vm1533_vm5, %v3956_v33, %v2584_v61  ;;  %v4191_v44 = vsel %vm1533_vm5, %v4060_v56, %v2589_v55  ;;  %v4195_v27 = vsel %vm1533_vm5, %v4064_v42, %v2588_v45  ;;  %v4854_v22 = vld [vmem:[#allocation37_spill] sm:$0xff] }
 0x134   : > { %v2936_v42 = vld [vmem:[%s3121_s7 + $0xe0] sm:$0xff] }
 0x135   : > { %2816 = vrot.lane.b32.xlu2 %v4853_v8, %s3030_s24  ;;  %v2825_v6 = vpack.i.bf16 %v2937_v24, %v2936_v42  ;;  %v1535_v8 = vsel %vm1533_vm5, %v3841_v25, %v2524_v16  ;;  %v2938_v24 = vld [vmem:[%s3121_s7 + $0x80] sm:$0xff] }
 0x136   : > { %2806 = vrot.lane.b32.xlu0 %v4847_v19, %s3028_s21  ;;  %2811 = vrot.lane.b32.xlu1 %v4854_v22, %s3030_s24  ;;  %v4856_v22 = vld [vmem:[#allocation32_spill] sm:$0xff] }
 0x137   : > { %v4203_v59 = vpop.permute.xlu2 %2651 }
 0x138   : > { %v2597_v33 = vpop.permute.xlu0 %2596  ;;  %v2602_v57 = vpop.permute.xlu1 %2601 }
 0x139   : > { %v2599_v14 = vunpack.i.h.bf16 %v2597_v33  ;;  %v2598_v56 = vunpack.i.l.bf16 %v2597_v33  ;;  %v2604_v61 = vunpack.i.h.bf16 %v2602_v57  ;;  %v2603_v50 = vunpack.i.l.bf16 %v2602_v57 }
 0x13a   : > { %v2624_v33 = vunpack.i.h.bf16 %v4152_v47 }
 0x13b   : > { %v4211_v15 = vsel %vm1533_vm5, %v3977_v29, %v2598_v56  ;;  %v4215_v19 = vsel %vm1533_vm5, %v3980_v63, %v2599_v14  ;;  %v2523_v29 = vunpack.i.l.bf16 %v4075_v54  ;;  %v2623_v54 = vunpack.i.l.bf16 %v4152_v47 }
 0x13c   : > { %v1568_v14 = vsel %vm1566_vm7, %v1535_v8, %v2604_v61  ;;  %v2544_v8 = vunpack.i.h.bf16 %v4098_v13 }
 0x13d   : > { %2831 = vrot.lane.b32.xlu2 %v4855_v9, %s3031_s26  ;;  %v1534_v45 = vsel %vm1533_vm5, %v3838_v2, %v2523_v29  ;;  %v4857_v2 = vld [vmem:[#allocation25_spill] sm:$0xff] }
 0x13e   : > { %2821 = vrot.lane.b32.xlu0 %v2820_v11, %s3029_s22  ;;  %2826 = vrot.lane.b32.xlu1 %v2825_v6, %s3029_s22  ;;  %v1567_v57 = vsel %vm1566_vm7, %v1534_v45, %v2603_v50  ;;  %v2939_v6 = vld [vmem:[%s3121_s7 + $0x88] sm:$0xff] }
 0x13f   : > { %v4221_v12 = vpop.permute.xlu2 %2666 }
 0x140   : > { %v4223_v20 = vpop.permute.xlu0 %2611  ;;  %v2617_v35 = vpop.permute.xlu1 %2616 }
 0x141   : > { %v2619_v63 = vunpack.i.h.bf16 %v2617_v35  ;;  %v2618_v55 = vunpack.i.l.bf16 %v2617_v35  ;;  %v2850_v35 = vpack.i.bf16 %v2939_v6, %v2938_v24  ;;  %v1543_v24 = vsel %vm1533_vm5, %v3984_v62, %v2544_v8  ;;  %v393_v62 = vld [vmem:[%s348_s13] sm:$0xff] }
 0x143   : > { %v1600_v25 = vsel %vm1599_vm8, %v1567_v57, %v2618_v55  ;;  %v1601_v56 = vsel %vm1599_vm8, %v1568_v14, %v2619_v63  ;;  %v4858_v63 = vld [vmem:[#allocation20_spill] sm:$0xff]  ;;  %v2608_v55 = vunpack.i.l.bf16 %v4123_v43 }
 0x144   : > { %v1633_v16 = vsel %vm1632_vm9, %v1600_v25, %v2623_v54  ;;  %v2639_v25 = vunpack.i.h.bf16 %v4179_v4 }
 0x145   : > { %2846 = vrot.lane.b32.xlu2 %v4856_v22, %s3030_s24  ;;  %v2543_v22 = vunpack.i.l.bf16 %v4098_v13  ;;  %v2563_v13 = vunpack.i.l.bf16 %v4054_v37 }
 0x146   : > { %2836 = vrot.lane.b32.xlu0 %v4857_v2, %s3031_s26  ;;  %2841 = vrot.lane.b32.xlu1 %v4852_v46, %s3028_s21  ;;  %v1634_v46 = vsel %vm1632_vm9, %v1601_v56, %v2624_v33  ;;  %v2609_v33 = vunpack.i.h.bf16 %v4123_v43  ;;  %v2614_v56 = vunpack.i.h.bf16 %v4223_v20  ;;  %v1569_v43 = vsel %vm1566_vm7, %v4091_v48, %v2608_v55  ;;  %v2940_v48 = vld [vmem:[%s3121_s7 + $0xc0] sm:$0xff] }
 0x147   : > { %v4243_v3 = vpop.permute.xlu2 %2681 }
 0x148   : > { %v2627_v53 = vpop.permute.xlu0 %2626  ;;  %v4245_v11 = vpop.permute.xlu1 %2631  ;;  %v1570_v6 = vsel %vm1566_vm7, %v4087_v39, %v2609_v33 }
 0x149   : > { %v2629_v47 = vunpack.i.h.bf16 %v2627_v53  ;;  %v2628_v42 = vunpack.i.l.bf16 %v2627_v53  ;;  %v2633_v53 = vunpack.i.l.bf16 %v4245_v11 }
 0x14b   : > { %v1666_v29 = vsel %vm1665_vm10, %v1633_v16, %v2628_v42  ;;  %v1667_v61 = vsel %vm1665_vm10, %v1634_v46, %v2629_v47  ;;  %v1603_v16 = vsel %vm1599_vm8, %v1570_v6, %v2639_v25  ;;  %v2654_v46 = vunpack.i.h.bf16 %v4203_v59  ;;  %v2942_v25 = vld [vmem:[%s3121_s7 + $0xf0] sm:$0xff] }
 0x14c   : > { %v1698_v50 = vpack.c.bf16 %v1667_v61, %v1666_v29  ;;  %v2653_v29 = vunpack.i.l.bf16 %v4203_v59  ;;  %v2941_v61 = vld [vmem:[%s3121_s7 + $0xc8] sm:$0xff]  ;;  %v1576_v55 = vsel %vm1566_vm7, %v1543_v24, %v2633_v53  ;;  %v4860_v59 = vld [vmem:[#allocation35_spill] sm:$0xff] }
 0x14d   : > { %2861 = vrot.lane.b32.xlu2 %v4855_v9, %s3028_s21  ;;  %v2638_v9 = vunpack.i.l.bf16 %v4179_v4  ;;  %v1542_v4 = vsel %vm1533_vm5, %v3988_v36, %v2543_v22  ;;  %v4859_v36 = vld [vmem:[#allocation42_spill] sm:$0xff] }
 0x14e   : > { %2851 = vrot.lane.b32.xlu0 %v2850_v35, %s3029_s22  ;;  %2856 = vrot.lane.b32.xlu1 %v4858_v63, %s3031_s26  ;;  %v394_v63 = vld [vmem:[%s348_s13 + $0x8] sm:$0xff]  ;;  %v1575_v39 = vsel %vm1566_vm7, %v1542_v4, %v2614_v56  ;;  %v589_v56 = vrot.slane %v2942_v25, 1 }
 0x14f   : > { %2180 = vmatmul.msk.bf16.vlgmr.msra.gmra.mxu0 %vm1734_vm11, %v1698_v50  ;;  %v4260_v45 = vpop.permute.xlu2 %2696  ;;  %v1602_v35 = vsel %vm1599_vm8, %v1569_v43, %v2638_v9  ;;  %v2880_v50 = vpack.i.bf16 %v2941_v61, %v2940_v48  ;;  %v2943_v43 = vld [vmem:[%s3121_s7 + $0xf8] sm:$0xff]  ;;  %v4305_v48 = vmul.f32 0.0, %v394_v63  ;;  %s305_s7 = sand.u32 1, %s3006_s16  }
 0x150   : > { %v2642_v54 = vpop.permute.xlu0 %2641  ;;  %v2647_v57 = vpop.permute.xlu1 %2646  ;;  %v2885_v6 = vpack.i.bf16 %v2943_v43, %v2942_v25  ;;  %v590_v24 = vrot.slane %v2943_v43, 1  ;;  %s2165_s14 = sshll.u32 %s305_s7, 1  ;;  %s2025_s8 = scalar_lea.sflag [#allocation3], %s305_s7 }
 0x151   : > { %v2644_v47 = vunpack.i.h.bf16 %v2642_v54  ;;  %v2643_v42 = vunpack.i.l.bf16 %v2642_v54  ;;  %v2649_v8 = vunpack.i.h.bf16 %v2647_v57  ;;  %v2648_v22 = vunpack.i.l.bf16 %v2647_v57 }
 0x152   : > { %v4303_v57 = vmul.f32 0.0, %v393_v62 }
 0x153   : > { %v1608_v33 = vsel %vm1599_vm8, %v1575_v39, %v2643_v42  ;;  %v1609_v9 = vsel %vm1599_vm8, %v1576_v55, %v2644_v47  ;;  %v1635_v42 = vsel %vm1632_vm9, %v1602_v35, %v2648_v22  ;;  %v1636_v47 = vsel %vm1632_vm9, %v1603_v16, %v2649_v8 }
 0x154   : > { %v1641_v39 = vsel %vm1632_vm9, %v1608_v33, %v2653_v29  ;;  %v1642_v55 = vsel %vm1632_vm9, %v1609_v9, %v2654_v46  ;;  %v486_v35 = vrot.slane %v4305_v48, 7  ;;  %v2668_v16 = vunpack.i.l.bf16 %v4221_v12 }
 0x155   : > { %2876 = vrot.lane.b32.xlu2 %v4859_v36, %s3030_s24  ;;  %v2634_v46 = vunpack.i.h.bf16 %v4245_v11  ;;  %v1550_v22 = vsel %vm1533_vm5, %v4024_v40, %v2563_v13  ;;  %v629_v33 = vsel %vm540_vm0, %v590_v24, 0.0  ;;  %v4861_v11 = vunpack.i.h.bf16 %v4054_v37 }
 0x156   : > { %2866 = vrot.lane.b32.xlu0 %v4857_v2, %s3028_s21  ;;  %2871 = vrot.lane.b32.xlu1 %v4860_v59, %s3030_s24  ;;  %v2684_v9 = vunpack.i.h.bf16 %v4243_v3 }
 0x157   : > { %v4299_v54 = vpop.permute.xlu2 %2711  ;;  %v1583_v37 = vsel %vm1566_vm7, %v1550_v22, %v2634_v46  ;;  %v2910_v46 = vpack.i.bf16 %v4305_v48, %v4303_v57  ;;  %v2669_v22 = vunpack.i.h.bf16 %v4221_v12 }
 0x158   : > { %v2657_v4 = vpop.permute.xlu0 %2656  ;;  %v2662_v53 = vpop.permute.xlu1 %2661 }
 0x159   : > { %v2659_v2 = vunpack.i.h.bf16 %v2657_v4  ;;  %v2658_v61 = vunpack.i.l.bf16 %v2657_v4  ;;  %v2664_v36 = vunpack.i.h.bf16 %v2662_v53  ;;  %v2663_v59 = vunpack.i.l.bf16 %v2662_v53 }
 0x15a   : > { %v485_v53 = vrot.slane %v4303_v57, 7 }
 0x15b   : > { %v1668_v25 = vsel %vm1665_vm10, %v1635_v42, %v2658_v61  ;;  %v1669_v43 = vsel %vm1665_vm10, %v1636_v47, %v2659_v2  ;;  %v1674_v62 = vsel %vm1665_vm10, %v1641_v39, %v2663_v59  ;;  %v1675_v63 = vsel %vm1665_vm10, %v1642_v55, %v2664_v36 }
 0x15c   : > { %v1699_v14 = vpack.c.bf16 %v1669_v43, %v1668_v25  ;;  %v1702_v4 = vpack.c.bf16 %v1675_v63, %v1674_v62  ;;  %v487_v29 = vsel %vm433_vm1, %v485_v53, %v486_v35  ;;  %v539_v8 = vsel %vm433_vm1, 0.0, %v485_v53 }
 0x15d   : > { %2891 = vrot.lane.b32.xlu2 %v4843_v26, %s3031_s26  ;;  %v591_v26 = vsel %vm540_vm0, %v589_v56, %v590_v24  ;;  %v2905_v40 = vpack.i.bf16 %v487_v29, %v539_v8  ;;  %v593_v39 = vrot.slane %v4305_v48, 1 }
 0x15e   : > { %2881 = vrot.lane.b32.xlu0 %v2880_v50, %s3029_s22  ;;  %2886 = vrot.lane.b32.xlu1 %v2885_v6, %s3029_s22  ;;  %v1551_v50 = vsel %vm1533_vm5, %v4020_v52, %v4861_v11  ;;  %v2683_v6 = vunpack.i.l.bf16 %v4243_v3  ;;  %v2895_v42 = vpack.i.bf16 %v629_v33, %v591_v26  ;;  %v592_v3 = vrot.slane %v4303_v57, 1 }
 0x15f   : > { %2181 = vmatmul.msk.bf16.gmra.mxu0 %vm1734_vm11, %v1699_v14  ;;  %2184 = vmatmul.msk.bf16.vlgmr.msra.gmra.mxu1 %vm1734_vm11, %v1702_v4  ;;  %v4337_v13 = vpop.permute.xlu2 %2726  ;;  %v1584_v24 = vsel %vm1566_vm7, %v1551_v50, %v2668_v16  ;;  %v630_v53 = vsel %vm540_vm0, %v593_v39, 0.0  ;;  %v2613_v26 = vunpack.i.l.bf16 %v4223_v20  ;;  %v2714_v50 = vunpack.i.h.bf16 %v4299_v54 }
 0x160   : > { %v2672_v2 = vpop.permute.xlu0 %2671  ;;  %v2677_v61 = vpop.permute.xlu1 %2676  ;;  %v594_v4 = vsel %vm540_vm0, %v592_v3, %v593_v39  ;;  %v1572_v57 = vsel %vm1566_vm7, %v4004_v17, %v2669_v22  ;;  %v2699_v17 = vunpack.i.h.bf16 %v4260_v45 }
 0x161   : > { %v2674_v14 = vunpack.i.h.bf16 %v2672_v2  ;;  %v2673_v36 = vunpack.i.l.bf16 %v2672_v2  ;;  %v2679_v59 = vunpack.i.h.bf16 %v2677_v61  ;;  %v2678_v56 = vunpack.i.l.bf16 %v2677_v61 }
 0x162   : > { %v2915_v29 = vpack.i.bf16 %v630_v53, %v594_v4  ;;  %v1571_v12 = vsel %vm1566_vm7, %v4001_v58, %v2613_v26  ;;  %v2698_v58 = vunpack.i.l.bf16 %v4260_v45 }
 0x163   : > { %v1616_v52 = vsel %vm1599_vm8, %v1583_v37, %v2673_v36  ;;  %v1617_v47 = vsel %vm1599_vm8, %v1584_v24, %v2674_v14 }
 0x164   : > { %v1649_v55 = vsel %vm1632_vm9, %v1616_v52, %v2678_v56  ;;  %v1650_v25 = vsel %vm1632_vm9, %v1617_v47, %v2679_v59 }
 0x165   : > { %v1682_v43 = vsel %vm1665_vm10, %v1649_v55, %v2683_v6  ;;  %v1683_v62 = vsel %vm1665_vm10, %v1650_v25, %v2684_v9  ;;  %2906 = vrot.lane.b32.xlu2 %v2905_v40, %s3030_s24  ;;  %v2713_v9 = vunpack.i.l.bf16 %v4299_v54 }
 0x166   : > { %2896 = vrot.lane.b32.xlu0 %v2895_v42, %s3031_s26  ;;  %2901 = vrot.lane.b32.xlu1 %v2895_v42, %s3028_s21  ;;  %v1706_v63 = vpack.c.bf16 %v1683_v62, %v1682_v43  ;;  %s4610_s21 = scalar_lea.vmem [#allocation2], %s2165_s14 }
 0x167   : > { %v4357_v8 = vpop.permute.xlu2 %2741  ;;  %s2038_s5 = sshll.u32 %s4610_s21, 4  ;;  %s2039_s5 = int_to_ptr.vmem [resolvable:$true] %s2038_s5 }
 0x168   : > { %v2687_v35 = vpop.permute.xlu0 %2686  ;;  %v2692_v16 = vpop.permute.xlu1 %2691  ;;  %2188 = vmatmul.msk.bf16.vlgmr.msra.gmra.mxu2 %vm1734_vm11, %v1706_v63 }
 0x169   : > { %v2694_v33 = vunpack.i.h.bf16 %v2692_v16  ;;  %v2693_v11 = vunpack.i.l.bf16 %v2692_v16  ;;  %v2689_v61 = vunpack.i.h.bf16 %v2687_v35  ;;  %v2688_v40 = vunpack.i.l.bf16 %v2687_v35 }
 0x16b   : > { %v1604_v14 = vsel %vm1599_vm8, %v1571_v12, %v2693_v11  ;;  %v1605_v36 = vsel %vm1599_vm8, %v1572_v57, %v2694_v33  ;;  %v1577_v52 = vsel %vm1566_vm7, %v4031_v5, %v2688_v40  ;;  %v1578_v47 = vsel %vm1566_vm7, %v4034_v60, %v2689_v61 }
 0x16c   : > { %v1610_v43 = vsel %vm1599_vm8, %v1577_v52, %v2698_v58  ;;  %v1611_v62 = vsel %vm1599_vm8, %v1578_v47, %v2699_v17 }
 0x16e   : > { %2911 = vrot.lane.b32.xlu0 %v2910_v46, %s3029_s22  ;;  %2916 = vrot.lane.b32.xlu1 %v2915_v29, %s3031_s26  ;;  %s2197_s22 = sshll.u32 %s3014_s18, 1 }
 0x16f   : > { %v2757_v37 = vpop.permute.xlu2 %2756  ;;  %s2036_s29 = scalar_lea.hbm %s4723_s4, %s2197_s22 }
 0x170   : > { %v2702_v6 = vpop.permute.xlu0 %2701  ;;  %v2707_v2 = vpop.permute.xlu1 %2706  ;;  %s2040_s6 = sshll.u32 %s2036_s29, 4  ;;  %s2041_s6 = int_to_ptr.hbm [resolvable:$true] %s2040_s6 }
 0x171   : > { %v2704_v48 = vunpack.i.h.bf16 %v2702_v6  ;;  %v2703_v20 = vunpack.i.l.bf16 %v2702_v6  ;;  %v2709_v3 = vunpack.i.h.bf16 %v2707_v2  ;;  %v2708_v39 = vunpack.i.l.bf16 %v2707_v2  ;;  %s2958_s9 = sshra.s32 %s2041_s6, 4  ;;  %s2959_s9 = int_to_ptr.hbm [resolvable:$true] %s2958_s9 }
 0x172   : > { %v2744_v6 = vunpack.i.h.bf16 %v4357_v8  ;;  %v2743_v2 = vunpack.i.l.bf16 %v4357_v8  ;;  %v2758_v8 = vunpack.i.l.bf16 %v2757_v37  ;;  %s2960_s18 = scalar_lea.hbm %s2959_s9, 2  ;;  %p2965_p1 = scmp.lt.s32.totalorder %s2959_s9, %s4723_s4 }
 0x173   : > { %v1637_v59 = vsel %vm1632_vm9, %v1604_v14, %v2703_v20  ;;  %v1638_v54 = vsel %vm1632_vm9, %v1605_v36, %v2704_v48  ;;  %v1643_v4 = vsel %vm1632_vm9, %v1610_v43, %v2708_v39  ;;  %v1644_v53 = vsel %vm1632_vm9, %v1611_v62, %v2709_v3  ;;  %p2961_p12 = scmp.ne.s32.totalorder %s2959_s9, %s2960_s18  ;;  %p2966_p2 = scmp.lt.s32.totalorder %s2964_s30, %s2960_s18 }
 0x174   : > { %v1670_v56 = vsel %vm1665_vm10, %v1637_v59, %v2713_v9  ;;  %v1671_v24 = vsel %vm1665_vm10, %v1638_v54, %v2714_v50  ;;  %v2729_v50 = vunpack.i.h.bf16 %v4337_v13  ;;  %v2728_v9 = vunpack.i.l.bf16 %v4337_v13 }
 0x175   : > { %v1700_v42 = vpack.c.bf16 %v1671_v24, %v1670_v56  ;;  %v2759_v36 = vunpack.i.h.bf16 %v2757_v37  ;;  %p2962_p13 = pnand %p2961_p12, %p3098_p4  ;;  %p2967_p3 = por %p2966_p2, %p2965_p1 }
 0x176   : > { %v1591_v14 = vsel %vm1566_vm7, %v4183_v21, %v2728_v9  ;;  %v1592_v13 = vsel %vm1566_vm7, %v4187_v0, %v2729_v50 }
 0x177   : > { %2182 = vmatmul.msk.bf16.gmra.mxu0 %vm1734_vm11, %v1700_v42  ;;  %v4389_v16 = vpop.permute.xlu2 %2771  ;;  %p2963_p0 = pneg %p2962_p13 }
 0x178   : > { %v2717_v55 = vpop.permute.xlu0 %2716  ;;  %v2722_v25 = vpop.permute.xlu1 %2721 }
 0x179   : > { %v2719_v63 = vunpack.i.h.bf16 %v2717_v55  ;;  %v2718_v45 = vunpack.i.l.bf16 %v2717_v55  ;;  %v2724_v22 = vunpack.i.h.bf16 %v2722_v25  ;;  %v2723_v26 = vunpack.i.l.bf16 %v2722_v25  ;;  %p2968_p5 = pnand %p2967_p3, %p2963_p0 }
 0x17b   : > { %v1676_v5 = vsel %vm1665_vm10, %v1643_v4, %v2718_v45  ;;  %v1677_v60 = vsel %vm1665_vm10, %v1644_v53, %v2719_v63  ;;  %v1585_v57 = vsel %vm1566_vm7, %v4159_v38, %v2723_v26  ;;  %v1586_v12 = vsel %vm1566_vm7, %v4163_v34, %v2724_v22 }
 0x17c   : > { %v1703_v35 = vpack.c.bf16 %v1677_v60, %v1676_v5  ;;  %v2774_v26 = vunpack.i.h.bf16 %v4389_v16 }
 0x17e   : > { %2185 = vmatmul.msk.bf16.gmra.mxu1 %vm1734_vm11, %v1703_v35 }
 0x17f   : > { %v2787_v38 = vpop.permute.xlu2 %2786 }
 0x180   : > { %v2732_v46 = vpop.permute.xlu0 %2731  ;;  %v2737_v29 = vpop.permute.xlu1 %2736  ;;  %v2788_v50 = vunpack.i.l.bf16 %v2787_v38 }
 0x181   : > { %v2734_v33 = vunpack.i.h.bf16 %v2732_v46  ;;  %v2733_v11 = vunpack.i.l.bf16 %v2732_v46  ;;  %v2739_v48 = vunpack.i.h.bf16 %v2737_v29  ;;  %v2738_v20 = vunpack.i.l.bf16 %v2737_v29 }
 0x183   : > { %v1618_v61 = vsel %vm1599_vm8, %v1585_v57, %v2733_v11  ;;  %v1619_v40 = vsel %vm1599_vm8, %v1586_v12, %v2734_v33  ;;  %v1624_v58 = vsel %vm1599_vm8, %v1591_v14, %v2738_v20  ;;  %v1625_v42 = vsel %vm1599_vm8, %v1592_v13, %v2739_v48 }
 0x184   : > { %v1651_v52 = vsel %vm1632_vm9, %v1618_v61, %v2743_v2  ;;  %v1652_v21 = vsel %vm1632_vm9, %v1619_v40, %v2744_v6  ;;  %v2773_v33 = vunpack.i.l.bf16 %v4389_v16  ;;  %v2789_v11 = vunpack.i.h.bf16 %v2787_v38 }
 0x187   : > { %v2802_v45 = vpop.permute.xlu2 %2801 }
 0x188   : > { %v2747_v59 = vpop.permute.xlu0 %2746  ;;  %v2752_v54 = vpop.permute.xlu1 %2751 }
 0x189   : > { %v2749_v56 = vunpack.i.h.bf16 %v2747_v59  ;;  %v2748_v24 = vunpack.i.l.bf16 %v2747_v59  ;;  %v2754_v34 = vunpack.i.h.bf16 %v2752_v54  ;;  %v2753_v17 = vunpack.i.l.bf16 %v2752_v54 }
 0x18b   : > { %v1657_v47 = vsel %vm1632_vm9, %v1624_v58, %v2748_v24  ;;  %v1658_v0 = vsel %vm1632_vm9, %v1625_v42, %v2749_v56  ;;  %v1684_v37 = vsel %vm1665_vm10, %v1651_v52, %v2753_v17  ;;  %v1685_v3 = vsel %vm1665_vm10, %v1652_v21, %v2754_v34 }
 0x18c   : > { %v1707_v39 = vpack.c.bf16 %v1685_v3, %v1684_v37  ;;  %v1690_v55 = vsel %vm1665_vm10, %v1657_v47, %v2758_v8  ;;  %v1691_v25 = vsel %vm1665_vm10, %v1658_v0, %v2759_v36  ;;  %v2804_v0 = vunpack.i.h.bf16 %v2802_v45 }
 0x18d   : > { %v1710_v43 = vpack.c.bf16 %v1691_v25, %v1690_v55  ;;  %v2803_v37 = vunpack.i.l.bf16 %v2802_v45 }
 0x18e   : > { %2189 = vmatmul.msk.bf16.gmra.mxu2 %vm1734_vm11, %v1707_v39 }
 0x18f   : > { %2192 = vmatmul.msk.bf16.vlgmr.msra.gmra.mxu3 %vm1734_vm11, %v1710_v43  ;;  %v4419_v9 = vpop.permute.xlu2 %2816 }
 0x190   : > { %v2762_v62 = vpop.permute.xlu0 %2761  ;;  %v2767_v63 = vpop.permute.xlu1 %2766 }
 0x191   : > { %v2764_v5 = vunpack.i.h.bf16 %v2762_v62  ;;  %v2763_v60 = vunpack.i.l.bf16 %v2762_v62  ;;  %v2769_v35 = vunpack.i.h.bf16 %v2767_v63  ;;  %v2768_v46 = vunpack.i.l.bf16 %v2767_v63 }
 0x192   : > { %v1587_v63 = vsel %vm1566_vm7, %v4171_v23, %v2803_v37 }
 0x193   : > { %v1573_v6 = vsel %vm1566_vm7, %v4108_v31, %v2763_v60  ;;  %v1574_v2 = vsel %vm1566_vm7, %v4112_v10, %v2764_v5  ;;  %v1579_v57 = vsel %vm1566_vm7, %v4131_v7, %v2768_v46  ;;  %v1580_v12 = vsel %vm1566_vm7, %v4135_v51, %v2769_v35 }
 0x194   : > { %v1606_v40 = vsel %vm1599_vm8, %v1573_v6, %v2773_v33  ;;  %v1607_v14 = vsel %vm1599_vm8, %v1574_v2, %v2774_v26 }
 0x197   : > { %v2832_v52 = vpop.permute.xlu2 %2831 }
 0x198   : > { %v2777_v4 = vpop.permute.xlu0 %2776  ;;  %v2782_v53 = vpop.permute.xlu1 %2781  ;;  %v2834_v55 = vunpack.i.h.bf16 %v2832_v52  ;;  %v2833_v25 = vunpack.i.l.bf16 %v2832_v52 }
 0x199   : > { %v2779_v29 = vunpack.i.h.bf16 %v2777_v4  ;;  %v2778_v22 = vunpack.i.l.bf16 %v2777_v4  ;;  %v2784_v48 = vunpack.i.h.bf16 %v2782_v53  ;;  %v2783_v20 = vunpack.i.l.bf16 %v2782_v53 }
 0x19a   : > { %v1588_v4 = vsel %vm1566_vm7, %v4167_v32, %v2804_v0  ;;  %v2818_v32 = vunpack.i.l.bf16 %v4419_v9 }
 0x19b   : > { %v1612_v16 = vsel %vm1599_vm8, %v1579_v57, %v2778_v22  ;;  %v1613_v61 = vsel %vm1599_vm8, %v1580_v12, %v2779_v29  ;;  %v1639_v7 = vsel %vm1632_vm9, %v1606_v40, %v2783_v20  ;;  %v1640_v51 = vsel %vm1632_vm9, %v1607_v14, %v2784_v48 }
 0x19c   : > { %v1645_v54 = vsel %vm1632_vm9, %v1612_v16, %v2788_v50  ;;  %v1646_v38 = vsel %vm1632_vm9, %v1613_v61, %v2789_v11  ;;  %v2819_v11 = vunpack.i.h.bf16 %v4419_v9 }
 0x19f   : > { %v2847_v53 = vpop.permute.xlu2 %2846 }
 0x1a0   : > { %v2792_v31 = vpop.permute.xlu0 %2791  ;;  %v2797_v13 = vpop.permute.xlu1 %2796 }
 0x1a1   : > { %v2794_v36 = vunpack.i.h.bf16 %v2792_v31  ;;  %v2793_v10 = vunpack.i.l.bf16 %v2792_v31  ;;  %v2799_v8 = vunpack.i.h.bf16 %v2797_v13  ;;  %v2798_v59 = vunpack.i.l.bf16 %v2797_v13 }
 0x1a3   : > { %v1672_v56 = vsel %vm1665_vm10, %v1639_v7, %v2793_v10  ;;  %v1673_v24 = vsel %vm1665_vm10, %v1640_v51, %v2794_v36  ;;  %v1678_v34 = vsel %vm1665_vm10, %v1645_v54, %v2798_v59  ;;  %v1679_v17 = vsel %vm1665_vm10, %v1646_v38, %v2799_v8 }
 0x1a4   : > { %v1701_v58 = vpack.c.bf16 %v1673_v24, %v1672_v56  ;;  %v1704_v42 = vpack.c.bf16 %v1679_v17, %v1678_v34  ;;  %v2849_v59 = vunpack.i.h.bf16 %v2847_v53  ;;  %v2848_v7 = vunpack.i.l.bf16 %v2847_v53 }
 0x1a6   : > { %2183 = vmatmul.msk.bf16.gmra.mxu0 %vm1734_vm11, %v1701_v58  ;;  %2186 = vmatmul.msk.bf16.gmra.mxu1 %vm1734_vm11, %v1704_v42 }
 0x1a8   : > { %v2807_v21 = vpop.permute.xlu0 %2806  ;;  %v2812_v47 = vpop.permute.xlu1 %2811 }
 0x1a9   : > { %v2814_v3 = vunpack.i.h.bf16 %v2812_v47  ;;  %v2813_v39 = vunpack.i.l.bf16 %v2812_v47  ;;  %v2809_v35 = vunpack.i.h.bf16 %v2807_v21  ;;  %v2808_v46 = vunpack.i.l.bf16 %v2807_v21 }
 0x1ab   : > { %v1620_v29 = vsel %vm1599_vm8, %v1587_v63, %v2813_v39  ;;  %v1621_v45 = vsel %vm1599_vm8, %v1588_v4, %v2814_v3  ;;  %v1593_v6 = vsel %vm1566_vm7, %v4195_v27, %v2808_v46  ;;  %v1594_v2 = vsel %vm1566_vm7, %v4191_v44, %v2809_v35  ;;  %v2862_v27 = vpop.permute.xlu2 %2861 }
 0x1ac   : > { %v1626_v16 = vsel %vm1599_vm8, %v1593_v6, %v2818_v32  ;;  %v1627_v61 = vsel %vm1599_vm8, %v1594_v2, %v2819_v11 }
 0x1b0   : > { %v2822_v43 = vpop.permute.xlu0 %2821  ;;  %v2827_v62 = vpop.permute.xlu1 %2826 }
 0x1b1   : > { %v2824_v5 = vunpack.i.h.bf16 %v2822_v43  ;;  %v2823_v60 = vunpack.i.l.bf16 %v2822_v43  ;;  %v2829_v57 = vunpack.i.h.bf16 %v2827_v62  ;;  %v2828_v12 = vunpack.i.l.bf16 %v2827_v62 }
 0x1b3   : > { %v1653_v22 = vsel %vm1632_vm9, %v1620_v29, %v2823_v60  ;;  %v1654_v26 = vsel %vm1632_vm9, %v1621_v45, %v2824_v5  ;;  %v1659_v9 = vsel %vm1632_vm9, %v1626_v16, %v2828_v12  ;;  %v1660_v31 = vsel %vm1632_vm9, %v1627_v61, %v2829_v57  ;;  %v2877_v0 = vpop.permute.xlu2 %2876 }
 0x1b4   : > { %v1686_v33 = vsel %vm1665_vm10, %v1653_v22, %v2833_v25  ;;  %v1687_v23 = vsel %vm1665_vm10, %v1654_v26, %v2834_v55  ;;  %v2864_v55 = vunpack.i.h.bf16 %v2862_v27  ;;  %v2863_v25 = vunpack.i.l.bf16 %v2862_v27 }
 0x1b5   : > { %v1708_v50 = vpack.c.bf16 %v1687_v23, %v1686_v33  ;;  %v2878_v2 = vunpack.i.l.bf16 %v2877_v0 }
 0x1b6   : > { %v1589_v35 = vsel %vm1566_vm7, %v4078_v1, %v2863_v25  ;;  %v1590_v46 = vsel %vm1566_vm7, %v4081_v41, %v2864_v55  ;;  %v2879_v1 = vunpack.i.h.bf16 %v2877_v0 }
 0x1b7   : > { %2190 = vmatmul.msk.bf16.gmra.mxu2 %vm1734_vm11, %v1708_v50 }
 0x1b8   : > { %v2837_v48 = vpop.permute.xlu0 %2836  ;;  %v2842_v20 = vpop.permute.xlu1 %2841 }
 0x1b9   : > { %v2839_v40 = vunpack.i.h.bf16 %v2837_v48  ;;  %v2838_v14 = vunpack.i.l.bf16 %v2837_v48  ;;  %v2844_v13 = vunpack.i.h.bf16 %v2842_v20  ;;  %v2843_v36 = vunpack.i.l.bf16 %v2842_v20 }
 0x1bb   : > { %v1692_v44 = vsel %vm1665_vm10, %v1659_v9, %v2838_v14  ;;  %v1693_v10 = vsel %vm1665_vm10, %v1660_v31, %v2839_v40  ;;  %v1581_v51 = vsel %vm1566_vm7, %v4143_v28, %v2843_v36  ;;  %v1582_v54 = vsel %vm1566_vm7, %v4139_v49, %v2844_v13  ;;  %v2892_v43 = vpop.permute.xlu2 %2891 }
 0x1bc   : > { %v1711_v8 = vpack.c.bf16 %v1693_v10, %v1692_v44  ;;  %v1614_v42 = vsel %vm1599_vm8, %v1581_v51, %v2848_v7  ;;  %v1615_v52 = vsel %vm1599_vm8, %v1582_v54, %v2849_v59  ;;  %v2894_v5 = vunpack.i.h.bf16 %v2892_v43 }
 0x1bd   : > { %v2893_v60 = vunpack.i.l.bf16 %v2892_v43 }
 0x1be   : > { %2193 = vmatmul.msk.bf16.gmra.mxu3 %vm1734_vm11, %v1711_v8 }
 0x1c0   : > { %v2852_v38 = vpop.permute.xlu0 %2851  ;;  %v2857_v56 = vpop.permute.xlu1 %2856 }
 0x1c1   : > { %v2854_v24 = vunpack.i.h.bf16 %v2852_v38  ;;  %v2853_v34 = vunpack.i.l.bf16 %v2852_v38  ;;  %v2859_v17 = vunpack.i.h.bf16 %v2857_v56  ;;  %v2858_v58 = vunpack.i.l.bf16 %v2857_v56 }
 0x1c3   : > { %v1647_v21 = vsel %vm1632_vm9, %v1614_v42, %v2853_v34  ;;  %v1648_v47 = vsel %vm1632_vm9, %v1615_v52, %v2854_v24  ;;  %v2907_v44 = vpop.permute.xlu2 %2906 }
 0x1c4   : > { %v1680_v28 = vsel %vm1665_vm10, %v1647_v21, %v2858_v58  ;;  %v1681_v37 = vsel %vm1665_vm10, %v1648_v47, %v2859_v17  ;;  %v2909_v59 = vunpack.i.h.bf16 %v2907_v44  ;;  %v2908_v7 = vunpack.i.l.bf16 %v2907_v44 }
 0x1c5   : > { %v1705_v49 = vpack.c.bf16 %v1681_v37, %v1680_v28 }
 0x1c7   : > { %2187 = vmatmul.msk.bf16.gmra.mxu1 %vm1734_vm11, %v1705_v49 }
 0x1c8   : > { %v2867_v3 = vpop.permute.xlu0 %2866  ;;  %v2872_v39 = vpop.permute.xlu1 %2871 }
 0x1c9   : > { %v2874_v62 = vunpack.i.h.bf16 %v2872_v39  ;;  %v2873_v63 = vunpack.i.l.bf16 %v2872_v39  ;;  %v2869_v22 = vunpack.i.h.bf16 %v2867_v3  ;;  %v2868_v26 = vunpack.i.l.bf16 %v2867_v3 }
 0x1cb   : > { %v1622_v33 = vsel %vm1599_vm8, %v1589_v35, %v2873_v63  ;;  %v1623_v23 = vsel %vm1599_vm8, %v1590_v46, %v2874_v62  ;;  %v1595_v41 = vsel %vm1566_vm7, %v4101_v18, %v2868_v26  ;;  %v1596_v12 = vsel %vm1566_vm7, %v4104_v30, %v2869_v22 }
 0x1cc   : > { %v1628_v40 = vsel %vm1599_vm8, %v1595_v41, %v2878_v2  ;;  %v1629_v14 = vsel %vm1599_vm8, %v1596_v12, %v2879_v1 }
 0x1d0   : > { %v2882_v4 = vpop.permute.xlu0 %2881  ;;  %v2887_v53 = vpop.permute.xlu1 %2886 }
 0x1d1   : > { %v2884_v29 = vunpack.i.h.bf16 %v2882_v4  ;;  %v2883_v45 = vunpack.i.l.bf16 %v2882_v4  ;;  %v2889_v48 = vunpack.i.h.bf16 %v2887_v53  ;;  %v2888_v20 = vunpack.i.l.bf16 %v2887_v53 }
 0x1d3   : > { %v1655_v11 = vsel %vm1632_vm9, %v1622_v33, %v2883_v45  ;;  %v1656_v32 = vsel %vm1632_vm9, %v1623_v23, %v2884_v29  ;;  %v1661_v27 = vsel %vm1632_vm9, %v1628_v40, %v2888_v20  ;;  %v1662_v13 = vsel %vm1632_vm9, %v1629_v14, %v2889_v48 }
 0x1d4   : > { %v1688_v50 = vsel %vm1665_vm10, %v1655_v11, %v2893_v60  ;;  %v1689_v6 = vsel %vm1665_vm10, %v1656_v32, %v2894_v5 }
 0x1d5   : > { %v1709_v57 = vpack.c.bf16 %v1689_v6, %v1688_v50 }
 0x1d7   : > { %2191 = vmatmul.msk.bf16.gmra.mxu2 %vm1734_vm11, %v1709_v57 }
 0x1d8   : > { %v2897_v16 = vpop.permute.xlu0 %2896  ;;  %v2902_v61 = vpop.permute.xlu1 %2901 }
 0x1d9   : > { %v2899_v9 = vunpack.i.h.bf16 %v2897_v16  ;;  %v2898_v31 = vunpack.i.l.bf16 %v2897_v16  ;;  %v2904_v18 = vunpack.i.h.bf16 %v2902_v61  ;;  %v2903_v36 = vunpack.i.l.bf16 %v2902_v61 }
 0x1db   : > { %v1694_v30 = vsel %vm1665_vm10, %v1661_v27, %v2898_v31  ;;  %v1695_v10 = vsel %vm1665_vm10, %v1662_v13, %v2899_v9  ;;  %v1597_v51 = vsel %vm1566_vm7, %v4211_v15, %v2903_v36  ;;  %v1598_v54 = vsel %vm1566_vm7, %v4215_v19, %v2904_v18  ;;  %v4510_v19 = vpop.f32.mrf.mxu0 }
 0x1dc   : > { %v1712_v8 = vpack.c.bf16 %v1695_v10, %v1694_v30  ;;  %v1630_v42 = vsel %vm1599_vm8, %v1597_v51, %v2908_v7  ;;  %v1631_v52 = vsel %vm1599_vm8, %v1598_v54, %v2909_v59  ;;  %v4519_v39 = vpop.f32.mrf.mxu1 }
 0x1de   : > { %2194 = vmatmul.msk.bf16.gmra.mxu3 %vm1734_vm11, %v1712_v8 }
 0x1e0   : > { %v2912_v38 = vpop.permute.xlu0 %2911  ;;  %v2917_v56 = vpop.permute.xlu1 %2916 }
 0x1e1   : > { %v2914_v24 = vunpack.i.h.bf16 %v2912_v38  ;;  %v2913_v34 = vunpack.i.l.bf16 %v2912_v38  ;;  %v2919_v17 = vunpack.i.h.bf16 %v2917_v56  ;;  %v2918_v58 = vunpack.i.l.bf16 %v2917_v56 }
 0x1e3   : > { %v1663_v21 = vsel %vm1632_vm9, %v1630_v42, %v2913_v34  ;;  %v1664_v47 = vsel %vm1632_vm9, %v1631_v52, %v2914_v24  ;;  %v4513_v37 = vpop.f32.mrf.mxu0 }
 0x1e4   : > { %v1696_v0 = vsel %vm1665_vm10, %v1663_v21, %v2918_v58  ;;  %v1697_v15 = vsel %vm1665_vm10, %v1664_v47, %v2919_v17  ;;  %v4523_v25 = vpop.f32.mrf.mxu1  ;;  %v1876_v53 = vadd.f32 %v4513_v37, %v4510_v19  ;;  %v3032_v21 = vmov 256.0  }
 0x1e5   : > { %v1713_v28 = vpack.c.bf16 %v1697_v15, %v1696_v0  ;;  %2920 = vrcp.f32 %v3032_v21 }
 0x1eb   : > { %v4515_v49 = vpop.f32.mrf.mxu0  ;;  %v4529_v63 = vpop.f32.mrf.mxu2 }
 0x1ec   : > { %v1877_v5 = vadd.f32 %v1876_v53, %v4515_v49  ;;  %v2921_v0 = vpop.eup %2920 }
 0x1ed   : > { %vm1918_vm12 = vweird.f32 %v2921_v0 }
 0x1ee   : > { %2195 = vmatmul.msk.bf16.gmra.mxu3 %vm1734_vm11, %v1713_v28 }
 0x1f3   : > { %v4517_v3 = vpop.f32.mrf.mxu0  ;;  %v4541_v45 = vpop.f32.mrf.mxu2 }
 0x1f4   : > { %v1878_v60 = vadd.f32 %v1877_v5, %v4517_v3  ;;  %v1914_v5 = vmul.f32 256.0, %v2921_v0 }
 0x1fb   : > { %v4521_v55 = vpop.f32.mrf.mxu0  ;;  %v4527_v62 = vpop.f32.mrf.mxu1 }
 0x1fc   : > { %v1879_v46 = vadd.f32 %v1878_v60, %v4521_v55 }
 0x203   : > { %v4525_v43 = vpop.f32.mrf.mxu0  ;;  %v4537_v35 = vpop.f32.mrf.mxu1 }
 0x204   : > { %v1880_v29 = vadd.f32 %v1879_v46, %v4525_v43 }
 0x211   : > { %v4550_v32 = vpop.f32.mrf.mxu2 }
 0x212   : > { %v4555_v1 = vpop.f32.mrf.mxu3 }
 0x219   : > { %v4558_v57 = vpop.f32.mrf.mxu2 }
 0x21a   : > { %v4564_v20 = vpop.f32.mrf.mxu3 }
 0x223   : > { %v4531_v4 = vpop.f32.mrf.mxu0  ;;  %v4547_v23 = vpop.f32.mrf.mxu1 }
 0x224   : > { %v1881_v26 = vadd.f32 %v1880_v29, %v4531_v4  ;;  %v1915_v29 = vsub.f32 1.0, %v1914_v5 }
 0x22b   : > { %v4543_v22 = vpop.f32.mrf.mxu0  ;;  %v4553_v6 = vpop.f32.mrf.mxu1 }
 0x22c   : > { %v1882_v33 = vadd.f32 %v1881_v26, %v4543_v22 }
 0x22e   : > { %v1883_v11 = vadd.f32 %v1882_v33, %v4519_v39 }
 0x230   : > { %v1884_v50 = vadd.f32 %v1883_v11, %v4523_v25  ;;  %v1916_v11 = vmul.f32 %v2921_v0, %v1915_v29 }
 0x232   : > { %v1885_v2 = vadd.f32 %v1884_v50, %v4527_v62 }
 0x234   : > { %v1886_v41 = vadd.f32 %v1885_v2, %v4537_v35 }
 0x236   : > { %v1887_v48 = vadd.f32 %v1886_v41, %v4547_v23  ;;  %v1917_v41 = vadd.f32 %v2921_v0, %v1916_v11 }
 0x238   : > { %v1888_v61 = vadd.f32 %v1887_v48, %v4553_v6  ;;  %v1919_v48 = vsel %vm1918_vm12, %v2921_v0, %v1917_v41 }
 0x23a   : > { %v4566_v16 = vpop.f32.mrf.mxu2 }
 0x241   : > { %v4573_v31 = vpop.f32.mrf.mxu3 }
 0x242   : > { %v4577_v18 = vpop.f32.mrf.mxu2 }
 0x244   : > { %v4561_v12 = vpop.f32.mrf.mxu1 }
 0x245   : > { %v1889_v40 = vadd.f32 %v1888_v61, %v4561_v12 }
 0x249   : > { %v4581_v30 = vpop.f32.mrf.mxu3 }
 0x24c   : > { %v4570_v14 = vpop.f32.mrf.mxu1 }
 0x24d   : > { %v1890_v9 = vadd.f32 %v1889_v40, %v4570_v14 }
 0x24f   : > { %v1891_v27 = vadd.f32 %v1890_v9, %v4529_v63 }
 0x251   : > { %v1892_v13 = vadd.f32 %v1891_v27, %v4541_v45 }
 0x253   : > { %v1893_v36 = vadd.f32 %v1892_v13, %v4550_v32 }
 0x255   : > { %v1894_v44 = vadd.f32 %v1893_v36, %v4558_v57 }
 0x257   : > { %v1895_v10 = vadd.f32 %v1894_v44, %v4566_v16 }
 0x259   : > { %v1896_v59 = vadd.f32 %v1895_v10, %v4577_v18 }
 0x25a   : > { %v4584_v8 = vpop.f32.mrf.mxu2 }
 0x25b   : > { %v1897_v7 = vadd.f32 %v1896_v59, %v4584_v8 }
 0x261   : > { %v4588_v51 = vpop.f32.mrf.mxu3 }
 0x262   : > { %v4590_v54 = vpop.f32.mrf.mxu2 }
 0x263   : > { %v1898_v38 = vadd.f32 %v1897_v7, %v4590_v54 }
 0x265   : > { %v1899_v56 = vadd.f32 %v1898_v38, %v4555_v1 }
 0x267   : > { %v1900_v24 = vadd.f32 %v1899_v56, %v4564_v20 }
 0x269   : > { %v1901_v34 = vadd.f32 %v1900_v24, %v4573_v31  ;;  %v4596_v17 = vpop.f32.mrf.mxu3 }
 0x26b   : > { %v1902_v58 = vadd.f32 %v1901_v34, %v4581_v30 }
 0x26d   : > { %v1903_v42 = vadd.f32 %v1902_v58, %v4588_v51 }
 0x26f   : > { %v1904_v47 = vadd.f32 %v1903_v42, %v4596_v17 }
 0x271   : > { %v4600_v52 = vpop.f32.mrf.mxu3 }
 0x272   : > { %v1905_v15 = vadd.f32 %v1904_v47, %v4600_v52 }
 0x279   : > { %v4604_v28 = vpop.f32.mrf.mxu3 }
 0x27a   : > { %v1906_v53 = vadd.f32 %v1905_v15, %v4604_v28 }
 0x27c   : > { %v1907_v60 = vrot.slane %v1906_v53, 4 }
 0x27e   : > { %v1908_v46 = vadd.f32 %v1907_v60, %v1906_v53 }
 0x280   : > { %v1909_v26 = vrot.slane %v1908_v46, 2 }
 0x282   : > { %v1910_v33 = vadd.f32 %v1909_v26, %v1908_v46 }
 0x284   : > { %v1911_v50 = vrot.slane %v1910_v33, 1 }
 0x286   : > { %v1912_v2 = vadd.f32 %v1911_v50, %v1910_v33 }
 0x288   : > { %2022 = vst [vmem:[%s4610_s21] sm:$0x1] %v1912_v2  ;;  %v4613_v61 = vmul.f32 %v1919_v48, %v1912_v2 }
 0x28a   : > { %v1921_v40 = vsub.f32 %v4510_v19, %v4613_v61  ;;  %v1922_v9 = vsub.f32 %v4513_v37, %v4613_v61  ;;  %v1923_v27 = vsub.f32 %v4515_v49, %v4613_v61  ;;  %v1924_v44 = vsub.f32 %v4517_v3, %v4613_v61 }
 0x28b   : > { %v1925_v10 = vsub.f32 %v4521_v55, %v4613_v61  ;;  %v1926_v38 = vsub.f32 %v4525_v43, %v4613_v61  ;;  %v1927_v37 = vsub.f32 %v4531_v4, %v4613_v61  ;;  %v1928_v34 = vsub.f32 %v4543_v22, %v4613_v61 }
 0x28c   : > { %v1953_v13 = vmul.f32 %v1921_v40, %v1921_v40  ;;  %v1954_v36 = vmul.f32 %v1922_v9, %v1922_v9  ;;  %v1955_v59 = vmul.f32 %v1923_v27, %v1923_v27  ;;  %v1956_v19 = vmul.f32 %v1924_v44, %v1924_v44 }
 0x28d   : > { %v1957_v24 = vmul.f32 %v1925_v10, %v1925_v10  ;;  %v1958_v58 = vmul.f32 %v1926_v38, %v1926_v38  ;;  %v1929_v55 = vsub.f32 %v4519_v39, %v4613_v61  ;;  %v1959_v42 = vmul.f32 %v1927_v37, %v1927_v37 }
 0x28e   : > { %v1985_v7 = vadd.f32 %v1954_v36, %v1953_v13  ;;  %v1930_v43 = vsub.f32 %v4523_v25, %v4613_v61  ;;  %v1960_v47 = vmul.f32 %v1928_v34, %v1928_v34  ;;  %v1931_v4 = vsub.f32 %v4527_v62, %v4613_v61 }
 0x28f   : > { %v1961_v15 = vmul.f32 %v1929_v55, %v1929_v55  ;;  %v1932_v22 = vsub.f32 %v4537_v35, %v4613_v61  ;;  %v1933_v39 = vsub.f32 %v4547_v23, %v4613_v61  ;;  %v1934_v25 = vsub.f32 %v4553_v6, %v4613_v61 }
 0x290   : > { %v1986_v56 = vadd.f32 %v1985_v7, %v1955_v59  ;;  %v1962_v5 = vmul.f32 %v1930_v43, %v1930_v43  ;;  %v1963_v46 = vmul.f32 %v1931_v4, %v1931_v4  ;;  %v1935_v62 = vsub.f32 %v4561_v12, %v4613_v61 }
 0x291   : > { %v1964_v26 = vmul.f32 %v1932_v22, %v1932_v22  ;;  %v1965_v11 = vmul.f32 %v1933_v39, %v1933_v39  ;;  %v1936_v35 = vsub.f32 %v4570_v14, %v4613_v61  ;;  %v1966_v2 = vmul.f32 %v1934_v25, %v1934_v25 }
 0x292   : > { %v1987_v49 = vadd.f32 %v1986_v56, %v1956_v19  ;;  %v1937_v23 = vsub.f32 %v4529_v63, %v4613_v61  ;;  %v1967_v48 = vmul.f32 %v1935_v62, %v1935_v62  ;;  %v1938_v6 = vsub.f32 %v4541_v45, %v4613_v61 }
 0x293   : > { %v1968_v9 = vmul.f32 %v1936_v35, %v1936_v35  ;;  %v1939_v12 = vsub.f32 %v4550_v32, %v4613_v61  ;;  %v1940_v14 = vsub.f32 %v4558_v57, %v4613_v61  ;;  %v1941_v63 = vsub.f32 %v4566_v16, %v4613_v61 }
 0x294   : > { %v1988_v3 = vadd.f32 %v1987_v49, %v1957_v24  ;;  %v1969_v13 = vmul.f32 %v1937_v23, %v1937_v23  ;;  %v1970_v44 = vmul.f32 %v1938_v6, %v1938_v6  ;;  %v1942_v45 = vsub.f32 %v4577_v18, %v4613_v61 }
 0x295   : > { %v1971_v59 = vmul.f32 %v1939_v12, %v1939_v12  ;;  %v1972_v38 = vmul.f32 %v1940_v14, %v1940_v14  ;;  %v1943_v32 = vsub.f32 %v4584_v8, %v4613_v61  ;;  %v1973_v56 = vmul.f32 %v1941_v63, %v1941_v63 }
 0x296   : > { %v1989_v21 = vadd.f32 %v1988_v3, %v1958_v58  ;;  %v1944_v57 = vsub.f32 %v4590_v54, %v4613_v61  ;;  %v1974_v24 = vmul.f32 %v1942_v45, %v1942_v45  ;;  %v1945_v16 = vsub.f32 %v4555_v1, %v4613_v61 }
 0x297   : > { %v1975_v34 = vmul.f32 %v1943_v32, %v1943_v32  ;;  %v1946_v18 = vsub.f32 %v4564_v20, %v4613_v61  ;;  %v1947_v8 = vsub.f32 %v4573_v31, %v4613_v61  ;;  %v1948_v54 = vsub.f32 %v4581_v30, %v4613_v61 }
 0x298   : > { %v1990_v0 = vadd.f32 %v1989_v21, %v1959_v42  ;;  %v1976_v3 = vmul.f32 %v1944_v57, %v1944_v57  ;;  %v1977_v42 = vmul.f32 %v1945_v16, %v1945_v16  ;;  %v1949_v1 = vsub.f32 %v4588_v51, %v4613_v61 }
 0x299   : > { %v1978_v43 = vmul.f32 %v1946_v18, %v1946_v18  ;;  %v1950_v20 = vsub.f32 %v4596_v17, %v4613_v61  ;;  %v1951_v31 = vsub.f32 %v4600_v52, %v4613_v61  ;;  %v1952_v30 = vsub.f32 %v4604_v28, %v4613_v61 }
 0x29a   : > { %v1991_v53 = vadd.f32 %v1990_v0, %v1960_v47  ;;  %v1979_v0 = vmul.f32 %v1947_v8, %v1947_v8  ;;  %v1981_v22 = vmul.f32 %v1949_v1, %v1949_v1 }
 0x29b   : > { %v1983_v51 = vmul.f32 %v1951_v31, %v1951_v31 }
 0x29c   : > { %v1992_v60 = vadd.f32 %v1991_v53, %v1961_v15  ;;  %v1980_v15 = vmul.f32 %v1948_v54, %v1948_v54 }
 0x29e   : > { %v1993_v29 = vadd.f32 %v1992_v60, %v1962_v5  ;;  %v1982_v60 = vmul.f32 %v1950_v20, %v1950_v20 }
 0x2a0   : > { %v1994_v33 = vadd.f32 %v1993_v29, %v1963_v46  ;;  %v1984_v29 = vmul.f32 %v1952_v30, %v1952_v30 }
 0x2a2   : > { %v1995_v50 = vadd.f32 %v1994_v33, %v1964_v26 }
 0x2a4   : > { %v1996_v41 = vadd.f32 %v1995_v50, %v1965_v11 }
 0x2a6   : > { %v1997_v40 = vadd.f32 %v1996_v41, %v1966_v2 }
 0x2a8   : > { %v1998_v27 = vadd.f32 %v1997_v40, %v1967_v48 }
 0x2aa   : > { %v1999_v36 = vadd.f32 %v1998_v27, %v1968_v9 }
 0x2ac   : > { %v2000_v10 = vadd.f32 %v1999_v36, %v1969_v13 }
 0x2ae   : > { %v2001_v7 = vadd.f32 %v2000_v10, %v1970_v44 }
 0x2b0   : > { %v2002_v19 = vadd.f32 %v2001_v7, %v1971_v59 }
 0x2b2   : > { %v2003_v37 = vadd.f32 %v2002_v19, %v1972_v38 }
 0x2b4   : > { %v2004_v49 = vadd.f32 %v2003_v37, %v1973_v56 }
 0x2b6   : > { %v2005_v58 = vadd.f32 %v2004_v49, %v1974_v24 }
 0x2b8   : > { %v2006_v55 = vadd.f32 %v2005_v58, %v1975_v34 }
 0x2ba   : > { %v2007_v21 = vadd.f32 %v2006_v55, %v1976_v3 }
 0x2bc   : > { %v2008_v47 = vadd.f32 %v2007_v21, %v1977_v42 }
 0x2be   : > { %v2009_v4 = vadd.f32 %v2008_v47, %v1978_v43 }
 0x2c0   : > { %v2010_v53 = vadd.f32 %v2009_v4, %v1979_v0 }
 0x2c2   : > { %v2011_v5 = vadd.f32 %v2010_v53, %v1980_v15 }
 0x2c4   : > { %v2012_v39 = vadd.f32 %v2011_v5, %v1981_v22 }
 0x2c6   : > { %v2013_v46 = vadd.f32 %v2012_v39, %v1982_v60 }
 0x2c8   : > { %v2014_v25 = vadd.f32 %v2013_v46, %v1983_v51 }
 0x2ca   : > { %v2015_v17 = vadd.f32 %v2014_v25, %v1984_v29 }
 0x2cc   : > { %v2016_v26 = vrot.slane %v2015_v17, 4 }
 0x2ce   : > { %v2017_v33 = vadd.f32 %v2016_v26, %v2015_v17 }
 0x2d0   : > { %v2018_v52 = vrot.slane %v2017_v33, 2 }
 0x2d2   : > { %v2019_v62 = vadd.f32 %v2018_v52, %v2017_v33 }
 0x2d4   : > { %v2020_v28 = vrot.slane %v2019_v62, 1 }
 0x2d6   : > { %v2021_v61 = vadd.f32 %v2020_v28, %v2019_v62 }
 0x2d8   : > { %2023 = vst [vmem:[%s4610_s21 + $0x1] sm:$0x1] %v2021_v61 }
 0x2d9   : > { %2971 = shalt.err (!%p2968_p5)
}
 0x2da   : > { %2216 = dma.vmem_to_hbm [thread:$0]  (%p3098_p4), %s2039_s5, 32, %s2041_s6, %s2025_s8  }
 0x2db PF: > { %p2222_p6 = scmp.ge.s32.totalorder %s3022_s20, 2  ;;  %s2052_s7 = sand.u32 1, %s3002_s15  }
 0x2dc   : > { %s2053_s14 = scalar_lea.sflag [#allocation3], %s2052_s7 }
 0x2dd   : > { %p2219_p7 = pnand %p2222_p6, %p3105_p8 }
 0x2df   : > { %p2220_p9 = pneg %p2219_p7 }
 0x2e1   : > { %2997 = dma.done.wait (%p2220_p9), %s2053_s14, 32  }
 0x2e2   : > { %2999 = vsyncadd (%p2220_p9), %s2053_s14, 4294967264  ;;  %s17_s20 = sadd.s32 1, %s3022_s20   ;;  %s4862_s15 = smov %s3006_s16 }
 0x2e3   : > { %p14_p10 = scmp.ge.s32.totalorder %s17_s20, 4   ;;  %s4863_s16 = smov %s3010_s17 }
 0x2e4   : > { %s4864_s17 = smov %s3111_s28  ;;  %s4865_s18 = smov %s3018_s19 }
 0x2e5   : > { %s4866_s19 = smov %s4868_s23  ;;  %16 = sbr.rel (!%p14_p10) target bundleno = 4 (0x4), region = 77 }
 0x2ea   :  { %2059 = vsyncpa [#allocation3], 1 }
 0x2eb   :  { %2061 = vsyncpa [#allocation3 + $0x1], 1 }

</bundles_post_ra>
